<compile_context>
chip_gen: v7x
topology: tpu7x:2x2x1
jax: 0.10.0
libtpu: 0.0.40
codegen_flags: <defaults>
</compile_context>

<pallas_src>
import functools

import jax
import jax.numpy as jnp
from jax.experimental import pallas as pl
from jax.experimental.pallas import tpu as pltpu

FEATURES = 13   # features_count
HIDDEN = 30     # LSTM hidden size
FC2 = 16        # fc2 output size
HP = 128        # per-gate slab width: HIDDEN padded to one full 128-lane group


def _sigmoid(x):
    # exp goes to the EUP; exact divide keeps numerics aligned with the reference.
    return 1.0 / (1.0 + jnp.exp(-x))


def _lstm_net_kernel(x_ref, wihT_ref, whhT_ref, b_ref,
                     w2T_ref, b2_ref, w3_ref, b3_ref,
                     out_ref, gx_ref, hs_ref, *, seq_len, batch):
    f32 = jnp.float32

    # ---- Prologue: batched input projection for ALL timesteps, bias folded in
    # once (off the serial h->h critical path). ------------------------------
    gx_ref[...] = (
        jnp.dot(x_ref[...], wihT_ref[...], preferred_element_type=f32)
        + b_ref[...]
    )                                                     # (T*B, 4*HP)

    whhT = whhT_ref[...]                                  # (HP, 4*HP); rows >= HIDDEN are 0

    h = jnp.zeros((batch, HP), f32)
    c = jnp.zeros((batch, HP), f32)

    # ---- Serial LSTM recurrence, fully unrolled (static trip count). Per step
    # only one h @ Whh matmul + element-wise gate math. Gate slabs are 128-lane
    # aligned so each gate slice is a straight full-vreg read.
    for t in range(seq_len):
        row = t * batch                                   # static offset
        gates = gx_ref[pl.ds(row, batch), :] + jnp.dot(
            h, whhT, preferred_element_type=f32)          # (B, 4*HP)
        # PyTorch gate order [i, f, g, o].
        i_g = _sigmoid(gates[:, 0 * HP:1 * HP])
        f_g = _sigmoid(gates[:, 1 * HP:2 * HP])
        g_g = jnp.tanh(gates[:, 2 * HP:3 * HP])
        o_g = _sigmoid(gates[:, 3 * HP:4 * HP])
        c = f_g * c + i_g * g_g
        h = o_g * jnp.tanh(c)
        hs_ref[pl.ds(row, batch), :] = h                  # stash h_t for the batched head

    # ---- Epilogue: MLP head batched over all T*B rows at once. --------------
    hs = hs_ref[...]                                      # (T*B, HP); padded lanes exactly 0
    y = hs * _sigmoid(hs)                                 # swish(lstm_out)
    y = jnp.dot(y, w2T_ref[...], preferred_element_type=f32) + b2_ref[...]   # (T*B, FC2)
    y = y * _sigmoid(y)                                   # swish(fc2)
    # fc3 has output width 1 -> lane reduction (VPU/XLU) instead of an MXU pass.
    y = jnp.sum(y * w3_ref[...], axis=-1, keepdims=True) + b3_ref[...]       # (T*B, 1)
    out_ref[...] = _sigmoid(y).astype(out_ref.dtype)      # single output store


def _full_spec(shape):
    n = len(shape)
    return pl.BlockSpec(shape, lambda i, _n=n: (0,) * _n)


def net_forward(x, kparams):
    """x: (T, B, FEATURES) f32 -> (T, B, 1) f32."""
    T, B, F = x.shape
    assert F == FEATURES
    wihT, whhT, b_comb, w2T, b2, w3, b3 = kparams

    x2 = x.reshape(T * B, F)                 # contiguous reshape, free in the wrapper
    args = (x2, wihT, whhT, b_comb, w2T, b2, w3, b3)

    kernel = functools.partial(_lstm_net_kernel, seq_len=T, batch=B)

    grid_spec = pltpu.PrefetchScalarGridSpec(
        num_scalar_prefetch=0,
        grid=(1,),                            # single step: everything VMEM-resident
        in_specs=[_full_spec(a.shape) for a in args],
        out_specs=pl.BlockSpec((T * B, 1), lambda i: (0, 0)),
        scratch_shapes=[
            pltpu.VMEM((T * B, 4 * HP), jnp.float32),   # gates_x for all timesteps (64 KB)
            pltpu.VMEM((T * B, HP), jnp.float32),       # h_t history for the batched head
        ],
    )

    out = pl.pallas_call(
        kernel,
        out_shape=jax.ShapeDtypeStruct((T * B, 1), jnp.float32),
        grid_spec=grid_spec,
        compiler_params=pltpu.CompilerParams(
            dimension_semantics=("arbitrary",),
        ),
    )(*args)
    return out.reshape(T, B, 1)


def init_params(key):
    """Deterministic init matching PyTorch param shapes (LSTM + fc2 + fc3)."""
    ks = jax.random.split(key, 8)

    def u(k, shape, bound):
        return jax.random.uniform(k, shape, jnp.float32, -bound, bound)

    k_lstm = 1.0 / jnp.sqrt(HIDDEN)
    # nn.LSTM(13, 30): weight_ih (4H, F), weight_hh (4H, H), b_ih (4H,), b_hh (4H,)
    w_ih = u(ks[0], (4 * HIDDEN, FEATURES), k_lstm)
    w_hh = u(ks[1], (4 * HIDDEN, HIDDEN), k_lstm)
    b_ih = u(ks[2], (4 * HIDDEN,), k_lstm)
    b_hh = u(ks[3], (4 * HIDDEN,), k_lstm)
    # nn.Linear(30, 16)
    k2 = 1.0 / jnp.sqrt(HIDDEN)
    w2 = u(ks[4], (FC2, HIDDEN), k2)
    b2 = u(ks[5], (FC2,), k2)
    # nn.Linear(16, 1)
    k3 = 1.0 / jnp.sqrt(FC2)
    w3 = u(ks[6], (1, FC2), k3)
    b3 = u(ks[7], (1,), k3)
    return dict(w_ih=w_ih, w_hh=w_hh, b_ih=b_ih, b_hh=b_hh,
                w2=w2, b2=b2, w3=w3, b3=b3)


def prepare_kernel_params(p):
    """Transpose + lane-pad PyTorch-layout weights into the kernel layout.

    Each of the 4 LSTM gates gets its own 128-lane slab so in-kernel gate
    slices are vreg-aligned; padded rows/columns are zero so they contribute
    nothing and the padded state lanes stay exactly zero.
    """
    wihT = jnp.zeros((FEATURES, 4 * HP), jnp.float32)
    whhT = jnp.zeros((HP, 4 * HP), jnp.float32)
    bias = jnp.zeros((1, 4 * HP), jnp.float32)
    b = p["b_ih"] + p["b_hh"]
    wihT_src = p["w_ih"].T                     # (F, 4H)
    whhT_src = p["w_hh"].T                     # (H, 4H)
    for g in range(4):
        src = slice(g * HIDDEN, (g + 1) * HIDDEN)
        dst = slice(g * HP, g * HP + HIDDEN)
        wihT = wihT.at[:, dst].set(wihT_src[:, src])
        whhT = whhT.at[:HIDDEN, dst].set(whhT_src[:, src])
        bias = bias.at[0, dst].set(b[src])
    w2T = jnp.zeros((HP, FC2), jnp.float32).at[:HIDDEN, :].set(p["w2"].T)
    b2 = p["b2"].reshape(1, FC2)
    w3 = p["w3"].reshape(1, FC2)               # used as a broadcast row for the lane reduce
    b3 = p["b3"].reshape(1, 1)
    return (wihT, whhT, bias, w2T, b2, w3, b3)


def reference_forward(x, p):
    """Pure-JAX reference of the PyTorch forward pass (for sanity checking)."""
    T, B, _ = x.shape
    wihT = p["w_ih"].T
    whhT = p["w_hh"].T
    b = (p["b_ih"] + p["b_hh"]).reshape(1, -1)
    h = jnp.zeros((B, HIDDEN), jnp.float32)
    c = jnp.zeros((B, HIDDEN), jnp.float32)

    def step(carry, x_t):
        h, c = carry
        gates = x_t @ wihT + h @ whhT + b
        i = jax.nn.sigmoid(gates[:, 0 * HIDDEN:1 * HIDDEN])
        f = jax.nn.sigmoid(gates[:, 1 * HIDDEN:2 * HIDDEN])
        g = jnp.tanh(gates[:, 2 * HIDDEN:3 * HIDDEN])
        o = jax.nn.sigmoid(gates[:, 3 * HIDDEN:4 * HIDDEN])
        c = f * c + i * g
        h = o * jnp.tanh(c)
        return (h, c), h

    _, hs = jax.lax.scan(step, (h, c), x)      # (T, B, H)
    y = hs * jax.nn.sigmoid(hs)
    y = y @ p["w2"].T + p["b2"]
    y = y * jax.nn.sigmoid(y)
    y = jax.nn.sigmoid(y @ p["w3"].T + p["b3"])
    return y


if __name__ == "__main__":
    key = jax.random.PRNGKey(0)
    k_x, k_p = jax.random.split(key)

    T, B = 8, 4
    x = jax.random.normal(k_x, (T, B, FEATURES), jnp.float32)
    torch_params = init_params(k_p)
    kparams = prepare_kernel_params(torch_params)

    out = net_forward(x, kparams)
    out = jax.block_until_ready(out)

    ref = reference_forward(x, torch_params)
    assert out.shape == (T, B, 1)
    assert jnp.allclose(out, ref, atol=1e-4, rtol=1e-4), \
        float(jnp.max(jnp.abs(out - ref)))

    print("KERNEL_OK")
</pallas_src>

<mosaic_0001>
module attributes {stable_mosaic.version = 11 : i64} {
  func.func @_lstm_net_kernel(%arg0: i32, %arg1: memref<32x13xf32, #tpu.memory_space<vmem>>, %arg2: memref<13x512xf32, #tpu.memory_space<vmem>>, %arg3: memref<128x512xf32, #tpu.memory_space<vmem>>, %arg4: memref<1x512xf32, #tpu.memory_space<vmem>>, %arg5: memref<128x16xf32, #tpu.memory_space<vmem>>, %arg6: memref<1x16xf32, #tpu.memory_space<vmem>>, %arg7: memref<1x16xf32, #tpu.memory_space<vmem>>, %arg8: memref<1x1xf32, #tpu.memory_space<vmem>>, %arg9: memref<32x1xf32, #tpu.memory_space<vmem>>, %arg10: memref<32x512xf32, #tpu.memory_space<vmem>>, %arg11: memref<32x128xf32, #tpu.memory_space<vmem>>) attributes {dimension_semantics = [#tpu.dimension_semantics<arbitrary>], iteration_bounds = array<i64: 1>, scalar_prefetch = 0 : i64, scratch_operands = 2 : i64, tpu.core_type = #tpu.core_type<tc>, window_params = [{pipeline_mode = #tpu.pipeline_mode<synchronous>, transform_indices = @transform_0, window_bounds = array<i64: 32, 13>}, {pipeline_mode = #tpu.pipeline_mode<synchronous>, transform_indices = @transform_1, window_bounds = array<i64: 13, 512>}, {pipeline_mode = #tpu.pipeline_mode<synchronous>, transform_indices = @transform_2, window_bounds = array<i64: 128, 512>}, {pipeline_mode = #tpu.pipeline_mode<synchronous>, transform_indices = @transform_3, window_bounds = array<i64: 1, 512>}, {pipeline_mode = #tpu.pipeline_mode<synchronous>, transform_indices = @transform_4, window_bounds = array<i64: 128, 16>}, {pipeline_mode = #tpu.pipeline_mode<synchronous>, transform_indices = @transform_5, window_bounds = array<i64: 1, 16>}, {pipeline_mode = #tpu.pipeline_mode<synchronous>, transform_indices = @transform_6, window_bounds = array<i64: 1, 16>}, {pipeline_mode = #tpu.pipeline_mode<synchronous>, transform_indices = @transform_7, window_bounds = array<i64: 1, 1>}, {pipeline_mode = #tpu.pipeline_mode<synchronous>, transform_indices = @transform_8, window_bounds = array<i64: 32, 1>}]} {
    %c0 = arith.constant 0 : index
    %c0_0 = arith.constant 0 : index
    %0 = vector.load %arg1[%c0, %c0_0] : memref<32x13xf32, #tpu.memory_space<vmem>>, vector<32x13xf32>
    %c0_1 = arith.constant 0 : index
    %c0_2 = arith.constant 0 : index
    %1 = vector.load %arg2[%c0_1, %c0_2] : memref<13x512xf32, #tpu.memory_space<vmem>>, vector<13x512xf32>
    %cst = arith.constant dense<0.000000e+00> : vector<32x512xf32>
    %2 = tpu.matmul %0, %1, %cst {dimension_numbers = #tpu.dot_dimension_numbers<[1], [0], [0], [1], [0, 0, 1, 1], [], []>} : vector<32x13xf32>, vector<13x512xf32>, vector<32x512xf32> -> vector<32x512xf32>
    %c0_3 = arith.constant 0 : index
    %c0_4 = arith.constant 0 : index
    %3 = vector.load %arg4[%c0_3, %c0_4] : memref<1x512xf32, #tpu.memory_space<vmem>>, vector<1x512xf32>
    %4 = vector.broadcast %3 : vector<1x512xf32> to vector<32x512xf32>
    %5 = arith.addf %2, %4 : vector<32x512xf32>
    %c0_5 = arith.constant 0 : index
    %c0_6 = arith.constant 0 : index
    %6 = vector.load %arg10[%c0_5, %c0_6] : memref<32x512xf32, #tpu.memory_space<vmem>>, vector<32x512xf32>
    tpu.vector_store %arg10[%c0_5, %c0_6], %5 {strides = array<i32>} : memref<32x512xf32, #tpu.memory_space<vmem>>, vector<32x512xf32>,
    %c0_7 = arith.constant 0 : index
    %c0_8 = arith.constant 0 : index
    %7 = vector.load %arg3[%c0_7, %c0_8] : memref<128x512xf32, #tpu.memory_space<vmem>>, vector<128x512xf32>
    %cst_9 = arith.constant 0.000000e+00 : f32
    %8 = vector.broadcast %cst_9 : f32 to vector<4x128xf32>
    %cst_10 = arith.constant 0.000000e+00 : f32
    %9 = vector.broadcast %cst_10 : f32 to vector<4x128xf32>
    %c0_11 = arith.constant 0 : index
    %c0_12 = arith.constant 0 : index
    %10 = vector.load %arg10[%c0_11, %c0_12] : memref<32x512xf32, #tpu.memory_space<vmem>>, vector<4x512xf32>
    %cst_13 = arith.constant dense<0.000000e+00> : vector<4x512xf32>
    %11 = tpu.matmul %8, %7, %cst_13 {dimension_numbers = #tpu.dot_dimension_numbers<[1], [0], [0], [1], [0, 0, 1, 1], [], []>} : vector<4x128xf32>, vector<128x512xf32>, vector<4x512xf32> -> vector<4x512xf32>
    %12 = arith.addf %10, %11 : vector<4x512xf32>
    %13 = vector.extract_strided_slice %12 {offsets = [0, 0], sizes = [4, 128], strides = [1, 1]} : vector<4x512xf32> to vector<4x128xf32>
    %cst_14 = arith.constant 0.000000e+00 : f32
    %14 = vector.broadcast %cst_14 : f32 to vector<4x128xf32>
    %15 = arith.subf %14, %13 : vector<4x128xf32>
    %16 = math.exp %15 : vector<4x128xf32>
    %cst_15 = arith.constant 1.000000e+00 : f32
    %17 = vector.broadcast %cst_15 : f32 to vector<4x128xf32>
    %18 = arith.addf %17, %16 : vector<4x128xf32>
    %cst_16 = arith.constant 1.000000e+00 : f32
    %19 = vector.broadcast %cst_16 : f32 to vector<4x128xf32>
    %20 = arith.divf %19, %18 : vector<4x128xf32>
    %21 = vector.extract_strided_slice %12 {offsets = [0, 128], sizes = [4, 128], strides = [1, 1]} : vector<4x512xf32> to vector<4x128xf32>
    %cst_17 = arith.constant 0.000000e+00 : f32
    %22 = vector.broadcast %cst_17 : f32 to vector<4x128xf32>
    %23 = arith.subf %22, %21 : vector<4x128xf32>
    %24 = math.exp %23 : vector<4x128xf32>
    %cst_18 = arith.constant 1.000000e+00 : f32
    %25 = vector.broadcast %cst_18 : f32 to vector<4x128xf32>
    %26 = arith.addf %25, %24 : vector<4x128xf32>
    %cst_19 = arith.constant 1.000000e+00 : f32
    %27 = vector.broadcast %cst_19 : f32 to vector<4x128xf32>
    %28 = arith.divf %27, %26 : vector<4x128xf32>
    %29 = vector.extract_strided_slice %12 {offsets = [0, 256], sizes = [4, 128], strides = [1, 1]} : vector<4x512xf32> to vector<4x128xf32>
    %30 = math.tanh %29 : vector<4x128xf32>
    %31 = vector.extract_strided_slice %12 {offsets = [0, 384], sizes = [4, 128], strides = [1, 1]} : vector<4x512xf32> to vector<4x128xf32>
    %cst_20 = arith.constant 0.000000e+00 : f32
    %32 = vector.broadcast %cst_20 : f32 to vector<4x128xf32>
    %33 = arith.subf %32, %31 : vector<4x128xf32>
    %34 = math.exp %33 : vector<4x128xf32>
    %cst_21 = arith.constant 1.000000e+00 : f32
    %35 = vector.broadcast %cst_21 : f32 to vector<4x128xf32>
    %36 = arith.addf %35, %34 : vector<4x128xf32>
    %cst_22 = arith.constant 1.000000e+00 : f32
    %37 = vector.broadcast %cst_22 : f32 to vector<4x128xf32>
    %38 = arith.divf %37, %36 : vector<4x128xf32>
    %39 = arith.mulf %28, %9 : vector<4x128xf32>
    %40 = arith.mulf %20, %30 : vector<4x128xf32>
    %41 = arith.addf %39, %40 : vector<4x128xf32>
    %42 = math.tanh %41 : vector<4x128xf32>
    %43 = arith.mulf %38, %42 : vector<4x128xf32>
    %c0_23 = arith.constant 0 : index
    %c0_24 = arith.constant 0 : index
    %44 = vector.load %arg11[%c0_23, %c0_24] : memref<32x128xf32, #tpu.memory_space<vmem>>, vector<4x128xf32>
    tpu.vector_store %arg11[%c0_23, %c0_24], %43 {strides = array<i32>} : memref<32x128xf32, #tpu.memory_space<vmem>>, vector<4x128xf32>,
    %c4 = arith.constant 4 : index
    %c0_25 = arith.constant 0 : index
    %45 = vector.load %arg10[%c4, %c0_25] : memref<32x512xf32, #tpu.memory_space<vmem>>, vector<4x512xf32>
    %cst_26 = arith.constant dense<0.000000e+00> : vector<4x512xf32>
    %46 = tpu.matmul %43, %7, %cst_26 {dimension_numbers = #tpu.dot_dimension_numbers<[1], [0], [0], [1], [0, 0, 1, 1], [], []>} : vector<4x128xf32>, vector<128x512xf32>, vector<4x512xf32> -> vector<4x512xf32>
    %47 = arith.addf %45, %46 : vector<4x512xf32>
    %48 = vector.extract_strided_slice %47 {offsets = [0, 0], sizes = [4, 128], strides = [1, 1]} : vector<4x512xf32> to vector<4x128xf32>
    %cst_27 = arith.constant 0.000000e+00 : f32
    %49 = vector.broadcast %cst_27 : f32 to vector<4x128xf32>
    %50 = arith.subf %49, %48 : vector<4x128xf32>
    %51 = math.exp %50 : vector<4x128xf32>
    %cst_28 = arith.constant 1.000000e+00 : f32
    %52 = vector.broadcast %cst_28 : f32 to vector<4x128xf32>
    %53 = arith.addf %52, %51 : vector<4x128xf32>
    %cst_29 = arith.constant 1.000000e+00 : f32
    %54 = vector.broadcast %cst_29 : f32 to vector<4x128xf32>
    %55 = arith.divf %54, %53 : vector<4x128xf32>
    %56 = vector.extract_strided_slice %47 {offsets = [0, 128], sizes = [4, 128], strides = [1, 1]} : vector<4x512xf32> to vector<4x128xf32>
    %cst_30 = arith.constant 0.000000e+00 : f32
    %57 = vector.broadcast %cst_30 : f32 to vector<4x128xf32>
    %58 = arith.subf %57, %56 : vector<4x128xf32>
    %59 = math.exp %58 : vector<4x128xf32>
    %cst_31 = arith.constant 1.000000e+00 : f32
    %60 = vector.broadcast %cst_31 : f32 to vector<4x128xf32>
    %61 = arith.addf %60, %59 : vector<4x128xf32>
    %cst_32 = arith.constant 1.000000e+00 : f32
    %62 = vector.broadcast %cst_32 : f32 to vector<4x128xf32>
    %63 = arith.divf %62, %61 : vector<4x128xf32>
    %64 = vector.extract_strided_slice %47 {offsets = [0, 256], sizes = [4, 128], strides = [1, 1]} : vector<4x512xf32> to vector<4x128xf32>
    %65 = math.tanh %64 : vector<4x128xf32>
    %66 = vector.extract_strided_slice %47 {offsets = [0, 384], sizes = [4, 128], strides = [1, 1]} : vector<4x512xf32> to vector<4x128xf32>
    %cst_33 = arith.constant 0.000000e+00 : f32
    %67 = vector.broadcast %cst_33 : f32 to vector<4x128xf32>
    %68 = arith.subf %67, %66 : vector<4x128xf32>
    %69 = math.exp %68 : vector<4x128xf32>
    %cst_34 = arith.constant 1.000000e+00 : f32
    %70 = vector.broadcast %cst_34 : f32 to vector<4x128xf32>
    %71 = arith.addf %70, %69 : vector<4x128xf32>
    %cst_35 = arith.constant 1.000000e+00 : f32
    %72 = vector.broadcast %cst_35 : f32 to vector<4x128xf32>
    %73 = arith.divf %72, %71 : vector<4x128xf32>
    %74 = arith.mulf %63, %41 : vector<4x128xf32>
    %75 = arith.mulf %55, %65 : vector<4x128xf32>
    %76 = arith.addf %74, %75 : vector<4x128xf32>
    %77 = math.tanh %76 : vector<4x128xf32>
    %78 = arith.mulf %73, %77 : vector<4x128xf32>
    %c4_36 = arith.constant 4 : index
    %c0_37 = arith.constant 0 : index
    %79 = vector.load %arg11[%c4_36, %c0_37] : memref<32x128xf32, #tpu.memory_space<vmem>>, vector<4x128xf32>
    tpu.vector_store %arg11[%c4_36, %c0_37], %78 {strides = array<i32>} : memref<32x128xf32, #tpu.memory_space<vmem>>, vector<4x128xf32>,
    %c8 = arith.constant 8 : index
    %c0_38 = arith.constant 0 : index
    %80 = vector.load %arg10[%c8, %c0_38] : memref<32x512xf32, #tpu.memory_space<vmem>>, vector<4x512xf32>
    %cst_39 = arith.constant dense<0.000000e+00> : vector<4x512xf32>
    %81 = tpu.matmul %78, %7, %cst_39 {dimension_numbers = #tpu.dot_dimension_numbers<[1], [0], [0], [1], [0, 0, 1, 1], [], []>} : vector<4x128xf32>, vector<128x512xf32>, vector<4x512xf32> -> vector<4x512xf32>
    %82 = arith.addf %80, %81 : vector<4x512xf32>
    %83 = vector.extract_strided_slice %82 {offsets = [0, 0], sizes = [4, 128], strides = [1, 1]} : vector<4x512xf32> to vector<4x128xf32>
    %cst_40 = arith.constant 0.000000e+00 : f32
    %84 = vector.broadcast %cst_40 : f32 to vector<4x128xf32>
    %85 = arith.subf %84, %83 : vector<4x128xf32>
    %86 = math.exp %85 : vector<4x128xf32>
    %cst_41 = arith.constant 1.000000e+00 : f32
    %87 = vector.broadcast %cst_41 : f32 to vector<4x128xf32>
    %88 = arith.addf %87, %86 : vector<4x128xf32>
    %cst_42 = arith.constant 1.000000e+00 : f32
    %89 = vector.broadcast %cst_42 : f32 to vector<4x128xf32>
    %90 = arith.divf %89, %88 : vector<4x128xf32>
    %91 = vector.extract_strided_slice %82 {offsets = [0, 128], sizes = [4, 128], strides = [1, 1]} : vector<4x512xf32> to vector<4x128xf32>
    %cst_43 = arith.constant 0.000000e+00 : f32
    %92 = vector.broadcast %cst_43 : f32 to vector<4x128xf32>
    %93 = arith.subf %92, %91 : vector<4x128xf32>
    %94 = math.exp %93 : vector<4x128xf32>
    %cst_44 = arith.constant 1.000000e+00 : f32
    %95 = vector.broadcast %cst_44 : f32 to vector<4x128xf32>
    %96 = arith.addf %95, %94 : vector<4x128xf32>
    %cst_45 = arith.constant 1.000000e+00 : f32
    %97 = vector.broadcast %cst_45 : f32 to vector<4x128xf32>
    %98 = arith.divf %97, %96 : vector<4x128xf32>
    %99 = vector.extract_strided_slice %82 {offsets = [0, 256], sizes = [4, 128], strides = [1, 1]} : vector<4x512xf32> to vector<4x128xf32>
    %100 = math.tanh %99 : vector<4x128xf32>
    %101 = vector.extract_strided_slice %82 {offsets = [0, 384], sizes = [4, 128], strides = [1, 1]} : vector<4x512xf32> to vector<4x128xf32>
    %cst_46 = arith.constant 0.000000e+00 : f32
    %102 = vector.broadcast %cst_46 : f32 to vector<4x128xf32>
    %103 = arith.subf %102, %101 : vector<4x128xf32>
    %104 = math.exp %103 : vector<4x128xf32>
    %cst_47 = arith.constant 1.000000e+00 : f32
    %105 = vector.broadcast %cst_47 : f32 to vector<4x128xf32>
    %106 = arith.addf %105, %104 : vector<4x128xf32>
    %cst_48 = arith.constant 1.000000e+00 : f32
    %107 = vector.broadcast %cst_48 : f32 to vector<4x128xf32>
    %108 = arith.divf %107, %106 : vector<4x128xf32>
    %109 = arith.mulf %98, %76 : vector<4x128xf32>
    %110 = arith.mulf %90, %100 : vector<4x128xf32>
    %111 = arith.addf %109, %110 : vector<4x128xf32>
    %112 = math.tanh %111 : vector<4x128xf32>
    %113 = arith.mulf %108, %112 : vector<4x128xf32>
    %c8_49 = arith.constant 8 : index
    %c0_50 = arith.constant 0 : index
    %114 = vector.load %arg11[%c8_49, %c0_50] : memref<32x128xf32, #tpu.memory_space<vmem>>, vector<4x128xf32>
    tpu.vector_store %arg11[%c8_49, %c0_50], %113 {strides = array<i32>} : memref<32x128xf32, #tpu.memory_space<vmem>>, vector<4x128xf32>,
    %c12 = arith.constant 12 : index
    %c0_51 = arith.constant 0 : index
    %115 = vector.load %arg10[%c12, %c0_51] : memref<32x512xf32, #tpu.memory_space<vmem>>, vector<4x512xf32>
    %cst_52 = arith.constant dense<0.000000e+00> : vector<4x512xf32>
    %116 = tpu.matmul %113, %7, %cst_52 {dimension_numbers = #tpu.dot_dimension_numbers<[1], [0], [0], [1], [0, 0, 1, 1], [], []>} : vector<4x128xf32>, vector<128x512xf32>, vector<4x512xf32> -> vector<4x512xf32>
    %117 = arith.addf %115, %116 : vector<4x512xf32>
    %118 = vector.extract_strided_slice %117 {offsets = [0, 0], sizes = [4, 128], strides = [1, 1]} : vector<4x512xf32> to vector<4x128xf32>
    %cst_53 = arith.constant 0.000000e+00 : f32
    %119 = vector.broadcast %cst_53 : f32 to vector<4x128xf32>
    %120 = arith.subf %119, %118 : vector<4x128xf32>
    %121 = math.exp %120 : vector<4x128xf32>
    %cst_54 = arith.constant 1.000000e+00 : f32
    %122 = vector.broadcast %cst_54 : f32 to vector<4x128xf32>
    %123 = arith.addf %122, %121 : vector<4x128xf32>
    %cst_55 = arith.constant 1.000000e+00 : f32
    %124 = vector.broadcast %cst_55 : f32 to vector<4x128xf32>
    %125 = arith.divf %124, %123 : vector<4x128xf32>
    %126 = vector.extract_strided_slice %117 {offsets = [0, 128], sizes = [4, 128], strides = [1, 1]} : vector<4x512xf32> to vector<4x128xf32>
    %cst_56 = arith.constant 0.000000e+00 : f32
    %127 = vector.broadcast %cst_56 : f32 to vector<4x128xf32>
    %128 = arith.subf %127, %126 : vector<4x128xf32>
    %129 = math.exp %128 : vector<4x128xf32>
    %cst_57 = arith.constant 1.000000e+00 : f32
    %130 = vector.broadcast %cst_57 : f32 to vector<4x128xf32>
    %131 = arith.addf %130, %129 : vector<4x128xf32>
    %cst_58 = arith.constant 1.000000e+00 : f32
    %132 = vector.broadcast %cst_58 : f32 to vector<4x128xf32>
    %133 = arith.divf %132, %131 : vector<4x128xf32>
    %134 = vector.extract_strided_slice %117 {offsets = [0, 256], sizes = [4, 128], strides = [1, 1]} : vector<4x512xf32> to vector<4x128xf32>
    %135 = math.tanh %134 : vector<4x128xf32>
    %136 = vector.extract_strided_slice %117 {offsets = [0, 384], sizes = [4, 128], strides = [1, 1]} : vector<4x512xf32> to vector<4x128xf32>
    %cst_59 = arith.constant 0.000000e+00 : f32
    %137 = vector.broadcast %cst_59 : f32 to vector<4x128xf32>
    %138 = arith.subf %137, %136 : vector<4x128xf32>
    %139 = math.exp %138 : vector<4x128xf32>
    %cst_60 = arith.constant 1.000000e+00 : f32
    %140 = vector.broadcast %cst_60 : f32 to vector<4x128xf32>
    %141 = arith.addf %140, %139 : vector<4x128xf32>
    %cst_61 = arith.constant 1.000000e+00 : f32
    %142 = vector.broadcast %cst_61 : f32 to vector<4x128xf32>
    %143 = arith.divf %142, %141 : vector<4x128xf32>
    %144 = arith.mulf %133, %111 : vector<4x128xf32>
    %145 = arith.mulf %125, %135 : vector<4x128xf32>
    %146 = arith.addf %144, %145 : vector<4x128xf32>
    %147 = math.tanh %146 : vector<4x128xf32>
    %148 = arith.mulf %143, %147 : vector<4x128xf32>
    %c12_62 = arith.constant 12 : index
    %c0_63 = arith.constant 0 : index
    %149 = vector.load %arg11[%c12_62, %c0_63] : memref<32x128xf32, #tpu.memory_space<vmem>>, vector<4x128xf32>
    tpu.vector_store %arg11[%c12_62, %c0_63], %148 {strides = array<i32>} : memref<32x128xf32, #tpu.memory_space<vmem>>, vector<4x128xf32>,
    %c16 = arith.constant 16 : index
    %c0_64 = arith.constant 0 : index
    %150 = vector.load %arg10[%c16, %c0_64] : memref<32x512xf32, #tpu.memory_space<vmem>>, vector<4x512xf32>
    %cst_65 = arith.constant dense<0.000000e+00> : vector<4x512xf32>
    %151 = tpu.matmul %148, %7, %cst_65 {dimension_numbers = #tpu.dot_dimension_numbers<[1], [0], [0], [1], [0, 0, 1, 1], [], []>} : vector<4x128xf32>, vector<128x512xf32>, vector<4x512xf32> -> vector<4x512xf32>
    %152 = arith.addf %150, %151 : vector<4x512xf32>
    %153 = vector.extract_strided_slice %152 {offsets = [0, 0], sizes = [4, 128], strides = [1, 1]} : vector<4x512xf32> to vector<4x128xf32>
    %cst_66 = arith.constant 0.000000e+00 : f32
    %154 = vector.broadcast %cst_66 : f32 to vector<4x128xf32>
    %155 = arith.subf %154, %153 : vector<4x128xf32>
    %156 = math.exp %155 : vector<4x128xf32>
    %cst_67 = arith.constant 1.000000e+00 : f32
    %157 = vector.broadcast %cst_67 : f32 to vector<4x128xf32>
    %158 = arith.addf %157, %156 : vector<4x128xf32>
    %cst_68 = arith.constant 1.000000e+00 : f32
    %159 = vector.broadcast %cst_68 : f32 to vector<4x128xf32>
    %160 = arith.divf %159, %158 : vector<4x128xf32>
    %161 = vector.extract_strided_slice %152 {offsets = [0, 128], sizes = [4, 128], strides = [1, 1]} : vector<4x512xf32> to vector<4x128xf32>
    %cst_69 = arith.constant 0.000000e+00 : f32
    %162 = vector.broadcast %cst_69 : f32 to vector<4x128xf32>
    %163 = arith.subf %162, %161 : vector<4x128xf32>
    %164 = math.exp %163 : vector<4x128xf32>
    %cst_70 = arith.constant 1.000000e+00 : f32
    %165 = vector.broadcast %cst_70 : f32 to vector<4x128xf32>
    %166 = arith.addf %165, %164 : vector<4x128xf32>
    %cst_71 = arith.constant 1.000000e+00 : f32
    %167 = vector.broadcast %cst_71 : f32 to vector<4x128xf32>
    %168 = arith.divf %167, %166 : vector<4x128xf32>
    %169 = vector.extract_strided_slice %152 {offsets = [0, 256], sizes = [4, 128], strides = [1, 1]} : vector<4x512xf32> to vector<4x128xf32>
    %170 = math.tanh %169 : vector<4x128xf32>
    %171 = vector.extract_strided_slice %152 {offsets = [0, 384], sizes = [4, 128], strides = [1, 1]} : vector<4x512xf32> to vector<4x128xf32>
    %cst_72 = arith.constant 0.000000e+00 : f32
    %172 = vector.broadcast %cst_72 : f32 to vector<4x128xf32>
    %173 = arith.subf %172, %171 : vector<4x128xf32>
    %174 = math.exp %173 : vector<4x128xf32>
    %cst_73 = arith.constant 1.000000e+00 : f32
    %175 = vector.broadcast %cst_73 : f32 to vector<4x128xf32>
    %176 = arith.addf %175, %174 : vector<4x128xf32>
    %cst_74 = arith.constant 1.000000e+00 : f32
    %177 = vector.broadcast %cst_74 : f32 to vector<4x128xf32>
    %178 = arith.divf %177, %176 : vector<4x128xf32>
    %179 = arith.mulf %168, %146 : vector<4x128xf32>
    %180 = arith.mulf %160, %170 : vector<4x128xf32>
    %181 = arith.addf %179, %180 : vector<4x128xf32>
    %182 = math.tanh %181 : vector<4x128xf32>
    %183 = arith.mulf %178, %182 : vector<4x128xf32>
    %c16_75 = arith.constant 16 : index
    %c0_76 = arith.constant 0 : index
    %184 = vector.load %arg11[%c16_75, %c0_76] : memref<32x128xf32, #tpu.memory_space<vmem>>, vector<4x128xf32>
    tpu.vector_store %arg11[%c16_75, %c0_76], %183 {strides = array<i32>} : memref<32x128xf32, #tpu.memory_space<vmem>>, vector<4x128xf32>,
    %c20 = arith.constant 20 : index
    %c0_77 = arith.constant 0 : index
    %185 = vector.load %arg10[%c20, %c0_77] : memref<32x512xf32, #tpu.memory_space<vmem>>, vector<4x512xf32>
    %cst_78 = arith.constant dense<0.000000e+00> : vector<4x512xf32>
    %186 = tpu.matmul %183, %7, %cst_78 {dimension_numbers = #tpu.dot_dimension_numbers<[1], [0], [0], [1], [0, 0, 1, 1], [], []>} : vector<4x128xf32>, vector<128x512xf32>, vector<4x512xf32> -> vector<4x512xf32>
    %187 = arith.addf %185, %186 : vector<4x512xf32>
    %188 = vector.extract_strided_slice %187 {offsets = [0, 0], sizes = [4, 128], strides = [1, 1]} : vector<4x512xf32> to vector<4x128xf32>
    %cst_79 = arith.constant 0.000000e+00 : f32
    %189 = vector.broadcast %cst_79 : f32 to vector<4x128xf32>
    %190 = arith.subf %189, %188 : vector<4x128xf32>
    %191 = math.exp %190 : vector<4x128xf32>
    %cst_80 = arith.constant 1.000000e+00 : f32
    %192 = vector.broadcast %cst_80 : f32 to vector<4x128xf32>
    %193 = arith.addf %192, %191 : vector<4x128xf32>
    %cst_81 = arith.constant 1.000000e+00 : f32
    %194 = vector.broadcast %cst_81 : f32 to vector<4x128xf32>
    %195 = arith.divf %194, %193 : vector<4x128xf32>
    %196 = vector.extract_strided_slice %187 {offsets = [0, 128], sizes = [4, 128], strides = [1, 1]} : vector<4x512xf32> to vector<4x128xf32>
    %cst_82 = arith.constant 0.000000e+00 : f32
    %197 = vector.broadcast %cst_82 : f32 to vector<4x128xf32>
    %198 = arith.subf %197, %196 : vector<4x128xf32>
    %199 = math.exp %198 : vector<4x128xf32>
    %cst_83 = arith.constant 1.000000e+00 : f32
    %200 = vector.broadcast %cst_83 : f32 to vector<4x128xf32>
    %201 = arith.addf %200, %199 : vector<4x128xf32>
    %cst_84 = arith.constant 1.000000e+00 : f32
    %202 = vector.broadcast %cst_84 : f32 to vector<4x128xf32>
    %203 = arith.divf %202, %201 : vector<4x128xf32>
    %204 = vector.extract_strided_slice %187 {offsets = [0, 256], sizes = [4, 128], strides = [1, 1]} : vector<4x512xf32> to vector<4x128xf32>
    %205 = math.tanh %204 : vector<4x128xf32>
    %206 = vector.extract_strided_slice %187 {offsets = [0, 384], sizes = [4, 128], strides = [1, 1]} : vector<4x512xf32> to vector<4x128xf32>
    %cst_85 = arith.constant 0.000000e+00 : f32
    %207 = vector.broadcast %cst_85 : f32 to vector<4x128xf32>
    %208 = arith.subf %207, %206 : vector<4x128xf32>
    %209 = math.exp %208 : vector<4x128xf32>
    %cst_86 = arith.constant 1.000000e+00 : f32
    %210 = vector.broadcast %cst_86 : f32 to vector<4x128xf32>
    %211 = arith.addf %210, %209 : vector<4x128xf32>
    %cst_87 = arith.constant 1.000000e+00 : f32
    %212 = vector.broadcast %cst_87 : f32 to vector<4x128xf32>
    %213 = arith.divf %212, %211 : vector<4x128xf32>
    %214 = arith.mulf %203, %181 : vector<4x128xf32>
    %215 = arith.mulf %195, %205 : vector<4x128xf32>
    %216 = arith.addf %214, %215 : vector<4x128xf32>
    %217 = math.tanh %216 : vector<4x128xf32>
    %218 = arith.mulf %213, %217 : vector<4x128xf32>
    %c20_88 = arith.constant 20 : index
    %c0_89 = arith.constant 0 : index
    %219 = vector.load %arg11[%c20_88, %c0_89] : memref<32x128xf32, #tpu.memory_space<vmem>>, vector<4x128xf32>
    tpu.vector_store %arg11[%c20_88, %c0_89], %218 {strides = array<i32>} : memref<32x128xf32, #tpu.memory_space<vmem>>, vector<4x128xf32>,
    %c24 = arith.constant 24 : index
    %c0_90 = arith.constant 0 : index
    %220 = vector.load %arg10[%c24, %c0_90] : memref<32x512xf32, #tpu.memory_space<vmem>>, vector<4x512xf32>
    %cst_91 = arith.constant dense<0.000000e+00> : vector<4x512xf32>
    %221 = tpu.matmul %218, %7, %cst_91 {dimension_numbers = #tpu.dot_dimension_numbers<[1], [0], [0], [1], [0, 0, 1, 1], [], []>} : vector<4x128xf32>, vector<128x512xf32>, vector<4x512xf32> -> vector<4x512xf32>
    %222 = arith.addf %220, %221 : vector<4x512xf32>
    %223 = vector.extract_strided_slice %222 {offsets = [0, 0], sizes = [4, 128], strides = [1, 1]} : vector<4x512xf32> to vector<4x128xf32>
    %cst_92 = arith.constant 0.000000e+00 : f32
    %224 = vector.broadcast %cst_92 : f32 to vector<4x128xf32>
    %225 = arith.subf %224, %223 : vector<4x128xf32>
    %226 = math.exp %225 : vector<4x128xf32>
    %cst_93 = arith.constant 1.000000e+00 : f32
    %227 = vector.broadcast %cst_93 : f32 to vector<4x128xf32>
    %228 = arith.addf %227, %226 : vector<4x128xf32>
    %cst_94 = arith.constant 1.000000e+00 : f32
    %229 = vector.broadcast %cst_94 : f32 to vector<4x128xf32>
    %230 = arith.divf %229, %228 : vector<4x128xf32>
    %231 = vector.extract_strided_slice %222 {offsets = [0, 128], sizes = [4, 128], strides = [1, 1]} : vector<4x512xf32> to vector<4x128xf32>
    %cst_95 = arith.constant 0.000000e+00 : f32
    %232 = vector.broadcast %cst_95 : f32 to vector<4x128xf32>
    %233 = arith.subf %232, %231 : vector<4x128xf32>
    %234 = math.exp %233 : vector<4x128xf32>
    %cst_96 = arith.constant 1.000000e+00 : f32
    %235 = vector.broadcast %cst_96 : f32 to vector<4x128xf32>
    %236 = arith.addf %235, %234 : vector<4x128xf32>
    %cst_97 = arith.constant 1.000000e+00 : f32
    %237 = vector.broadcast %cst_97 : f32 to vector<4x128xf32>
    %238 = arith.divf %237, %236 : vector<4x128xf32>
    %239 = vector.extract_strided_slice %222 {offsets = [0, 256], sizes = [4, 128], strides = [1, 1]} : vector<4x512xf32> to vector<4x128xf32>
    %240 = math.tanh %239 : vector<4x128xf32>
    %241 = vector.extract_strided_slice %222 {offsets = [0, 384], sizes = [4, 128], strides = [1, 1]} : vector<4x512xf32> to vector<4x128xf32>
    %cst_98 = arith.constant 0.000000e+00 : f32
    %242 = vector.broadcast %cst_98 : f32 to vector<4x128xf32>
    %243 = arith.subf %242, %241 : vector<4x128xf32>
    %244 = math.exp %243 : vector<4x128xf32>
    %cst_99 = arith.constant 1.000000e+00 : f32
    %245 = vector.broadcast %cst_99 : f32 to vector<4x128xf32>
    %246 = arith.addf %245, %244 : vector<4x128xf32>
    %cst_100 = arith.constant 1.000000e+00 : f32
    %247 = vector.broadcast %cst_100 : f32 to vector<4x128xf32>
    %248 = arith.divf %247, %246 : vector<4x128xf32>
    %249 = arith.mulf %238, %216 : vector<4x128xf32>
    %250 = arith.mulf %230, %240 : vector<4x128xf32>
    %251 = arith.addf %249, %250 : vector<4x128xf32>
    %252 = math.tanh %251 : vector<4x128xf32>
    %253 = arith.mulf %248, %252 : vector<4x128xf32>
    %c24_101 = arith.constant 24 : index
    %c0_102 = arith.constant 0 : index
    %254 = vector.load %arg11[%c24_101, %c0_102] : memref<32x128xf32, #tpu.memory_space<vmem>>, vector<4x128xf32>
    tpu.vector_store %arg11[%c24_101, %c0_102], %253 {strides = array<i32>} : memref<32x128xf32, #tpu.memory_space<vmem>>, vector<4x128xf32>,
    %c28 = arith.constant 28 : index
    %c0_103 = arith.constant 0 : index
    %255 = vector.load %arg10[%c28, %c0_103] : memref<32x512xf32, #tpu.memory_space<vmem>>, vector<4x512xf32>
    %cst_104 = arith.constant dense<0.000000e+00> : vector<4x512xf32>
    %256 = tpu.matmul %253, %7, %cst_104 {dimension_numbers = #tpu.dot_dimension_numbers<[1], [0], [0], [1], [0, 0, 1, 1], [], []>} : vector<4x128xf32>, vector<128x512xf32>, vector<4x512xf32> -> vector<4x512xf32>
    %257 = arith.addf %255, %256 : vector<4x512xf32>
    %258 = vector.extract_strided_slice %257 {offsets = [0, 0], sizes = [4, 128], strides = [1, 1]} : vector<4x512xf32> to vector<4x128xf32>
    %cst_105 = arith.constant 0.000000e+00 : f32
    %259 = vector.broadcast %cst_105 : f32 to vector<4x128xf32>
    %260 = arith.subf %259, %258 : vector<4x128xf32>
    %261 = math.exp %260 : vector<4x128xf32>
    %cst_106 = arith.constant 1.000000e+00 : f32
    %262 = vector.broadcast %cst_106 : f32 to vector<4x128xf32>
    %263 = arith.addf %262, %261 : vector<4x128xf32>
    %cst_107 = arith.constant 1.000000e+00 : f32
    %264 = vector.broadcast %cst_107 : f32 to vector<4x128xf32>
    %265 = arith.divf %264, %263 : vector<4x128xf32>
    %266 = vector.extract_strided_slice %257 {offsets = [0, 128], sizes = [4, 128], strides = [1, 1]} : vector<4x512xf32> to vector<4x128xf32>
    %cst_108 = arith.constant 0.000000e+00 : f32
    %267 = vector.broadcast %cst_108 : f32 to vector<4x128xf32>
    %268 = arith.subf %267, %266 : vector<4x128xf32>
    %269 = math.exp %268 : vector<4x128xf32>
    %cst_109 = arith.constant 1.000000e+00 : f32
    %270 = vector.broadcast %cst_109 : f32 to vector<4x128xf32>
    %271 = arith.addf %270, %269 : vector<4x128xf32>
    %cst_110 = arith.constant 1.000000e+00 : f32
    %272 = vector.broadcast %cst_110 : f32 to vector<4x128xf32>
    %273 = arith.divf %272, %271 : vector<4x128xf32>
    %274 = vector.extract_strided_slice %257 {offsets = [0, 256], sizes = [4, 128], strides = [1, 1]} : vector<4x512xf32> to vector<4x128xf32>
    %275 = math.tanh %274 : vector<4x128xf32>
    %276 = vector.extract_strided_slice %257 {offsets = [0, 384], sizes = [4, 128], strides = [1, 1]} : vector<4x512xf32> to vector<4x128xf32>
    %cst_111 = arith.constant 0.000000e+00 : f32
    %277 = vector.broadcast %cst_111 : f32 to vector<4x128xf32>
    %278 = arith.subf %277, %276 : vector<4x128xf32>
    %279 = math.exp %278 : vector<4x128xf32>
    %cst_112 = arith.constant 1.000000e+00 : f32
    %280 = vector.broadcast %cst_112 : f32 to vector<4x128xf32>
    %281 = arith.addf %280, %279 : vector<4x128xf32>
    %cst_113 = arith.constant 1.000000e+00 : f32
    %282 = vector.broadcast %cst_113 : f32 to vector<4x128xf32>
    %283 = arith.divf %282, %281 : vector<4x128xf32>
    %284 = arith.mulf %273, %251 : vector<4x128xf32>
    %285 = arith.mulf %265, %275 : vector<4x128xf32>
    %286 = arith.addf %284, %285 : vector<4x128xf32>
    %287 = math.tanh %286 : vector<4x128xf32>
    %288 = arith.mulf %283, %287 : vector<4x128xf32>
    %c28_114 = arith.constant 28 : index
    %c0_115 = arith.constant 0 : index
    %289 = vector.load %arg11[%c28_114, %c0_115] : memref<32x128xf32, #tpu.memory_space<vmem>>, vector<4x128xf32>
    tpu.vector_store %arg11[%c28_114, %c0_115], %288 {strides = array<i32>} : memref<32x128xf32, #tpu.memory_space<vmem>>, vector<4x128xf32>,
    %c0_116 = arith.constant 0 : index
    %c0_117 = arith.constant 0 : index
    %290 = vector.load %arg11[%c0_116, %c0_117] : memref<32x128xf32, #tpu.memory_space<vmem>>, vector<32x128xf32>
    %cst_118 = arith.constant 0.000000e+00 : f32
    %291 = vector.broadcast %cst_118 : f32 to vector<32x128xf32>
    %292 = arith.subf %291, %290 : vector<32x128xf32>
    %293 = math.exp %292 : vector<32x128xf32>
    %cst_119 = arith.constant 1.000000e+00 : f32
    %294 = vector.broadcast %cst_119 : f32 to vector<32x128xf32>
    %295 = arith.addf %294, %293 : vector<32x128xf32>
    %cst_120 = arith.constant 1.000000e+00 : f32
    %296 = vector.broadcast %cst_120 : f32 to vector<32x128xf32>
    %297 = arith.divf %296, %295 : vector<32x128xf32>
    %298 = arith.mulf %290, %297 : vector<32x128xf32>
    %c0_121 = arith.constant 0 : index
    %c0_122 = arith.constant 0 : index
    %299 = vector.load %arg5[%c0_121, %c0_122] : memref<128x16xf32, #tpu.memory_space<vmem>>, vector<128x16xf32>
    %cst_123 = arith.constant dense<0.000000e+00> : vector<32x16xf32>
    %300 = tpu.matmul %298, %299, %cst_123 {dimension_numbers = #tpu.dot_dimension_numbers<[1], [0], [0], [1], [0, 0, 1, 1], [], []>} : vector<32x128xf32>, vector<128x16xf32>, vector<32x16xf32> -> vector<32x16xf32>
    %c0_124 = arith.constant 0 : index
    %c0_125 = arith.constant 0 : index
    %301 = vector.load %arg6[%c0_124, %c0_125] : memref<1x16xf32, #tpu.memory_space<vmem>>, vector<1x16xf32>
    %302 = vector.broadcast %301 : vector<1x16xf32> to vector<32x16xf32>
    %303 = arith.addf %300, %302 : vector<32x16xf32>
    %cst_126 = arith.constant 0.000000e+00 : f32
    %304 = vector.broadcast %cst_126 : f32 to vector<32x16xf32>
    %305 = arith.subf %304, %303 : vector<32x16xf32>
    %306 = math.exp %305 : vector<32x16xf32>
    %cst_127 = arith.constant 1.000000e+00 : f32
    %307 = vector.broadcast %cst_127 : f32 to vector<32x16xf32>
    %308 = arith.addf %307, %306 : vector<32x16xf32>
    %cst_128 = arith.constant 1.000000e+00 : f32
    %309 = vector.broadcast %cst_128 : f32 to vector<32x16xf32>
    %310 = arith.divf %309, %308 : vector<32x16xf32>
    %311 = arith.mulf %303, %310 : vector<32x16xf32>
    %c0_129 = arith.constant 0 : index
    %c0_130 = arith.constant 0 : index
    %312 = vector.load %arg7[%c0_129, %c0_130] : memref<1x16xf32, #tpu.memory_space<vmem>>, vector<1x16xf32>
    %313 = vector.broadcast %312 : vector<1x16xf32> to vector<32x16xf32>
    %314 = arith.mulf %311, %313 : vector<32x16xf32>
    %cst_131 = arith.constant dense<0.000000e+00> : vector<32xf32>
    %315 = vector.multi_reduction <add>, %314, %cst_131 [1] : vector<32x16xf32> to vector<32xf32>
    %316 = vector.shape_cast %315 : vector<32xf32> to vector<32x1xf32>
    %c0_132 = arith.constant 0 : index
    %c0_133 = arith.constant 0 : index
    %317 = vector.load %arg8[%c0_132, %c0_133] : memref<1x1xf32, #tpu.memory_space<vmem>>, vector<1x1xf32>
    %318 = vector.broadcast %317 : vector<1x1xf32> to vector<32x1xf32>
    %319 = arith.addf %316, %318 : vector<32x1xf32>
    %cst_134 = arith.constant 0.000000e+00 : f32
    %320 = vector.broadcast %cst_134 : f32 to vector<32x1xf32>
    %321 = arith.subf %320, %319 : vector<32x1xf32>
    %322 = math.exp %321 : vector<32x1xf32>
    %cst_135 = arith.constant 1.000000e+00 : f32
    %323 = vector.broadcast %cst_135 : f32 to vector<32x1xf32>
    %324 = arith.addf %323, %322 : vector<32x1xf32>
    %cst_136 = arith.constant 1.000000e+00 : f32
    %325 = vector.broadcast %cst_136 : f32 to vector<32x1xf32>
    %326 = arith.divf %325, %324 : vector<32x1xf32>
    %c0_137 = arith.constant 0 : index
    %c0_138 = arith.constant 0 : index
    %327 = vector.load %arg9[%c0_137, %c0_138] : memref<32x1xf32, #tpu.memory_space<vmem>>, vector<32x1xf32>
    tpu.vector_store %arg9[%c0_137, %c0_138], %326 {strides = array<i32>} : memref<32x1xf32, #tpu.memory_space<vmem>>, vector<32x1xf32>,
    return
  }
  func.func @transform_0(%arg0: i32) -> (i32, i32) {
    %c0_i32 = arith.constant 0 : i32
    %c0_i32_0 = arith.constant 0 : i32
    %c0_i32_1 = arith.constant 0 : i32
    return %c0_i32, %c0_i32_0 : i32, i32
  }
  func.func @transform_1(%arg0: i32) -> (i32, i32) {
    %c0_i32 = arith.constant 0 : i32
    %c0_i32_0 = arith.constant 0 : i32
    %c0_i32_1 = arith.constant 0 : i32
    return %c0_i32, %c0_i32_0 : i32, i32
  }
  func.func @transform_2(%arg0: i32) -> (i32, i32) {
    %c0_i32 = arith.constant 0 : i32
    %c0_i32_0 = arith.constant 0 : i32
    %c0_i32_1 = arith.constant 0 : i32
    return %c0_i32, %c0_i32_0 : i32, i32
  }
  func.func @transform_3(%arg0: i32) -> (i32, i32) {
    %c0_i32 = arith.constant 0 : i32
    %c0_i32_0 = arith.constant 0 : i32
    %c0_i32_1 = arith.constant 0 : i32
    return %c0_i32, %c0_i32_0 : i32, i32
  }
  func.func @transform_4(%arg0: i32) -> (i32, i32) {
    %c0_i32 = arith.constant 0 : i32
    %c0_i32_0 = arith.constant 0 : i32
    %c0_i32_1 = arith.constant 0 : i32
    return %c0_i32, %c0_i32_0 : i32, i32
  }
  func.func @transform_5(%arg0: i32) -> (i32, i32) {
    %c0_i32 = arith.constant 0 : i32
    %c0_i32_0 = arith.constant 0 : i32
    %c0_i32_1 = arith.constant 0 : i32
    return %c0_i32, %c0_i32_0 : i32, i32
  }
  func.func @transform_6(%arg0: i32) -> (i32, i32) {
    %c0_i32 = arith.constant 0 : i32
    %c0_i32_0 = arith.constant 0 : i32
    %c0_i32_1 = arith.constant 0 : i32
    return %c0_i32, %c0_i32_0 : i32, i32
  }
  func.func @transform_7(%arg0: i32) -> (i32, i32) {
    %c0_i32 = arith.constant 0 : i32
    %c0_i32_0 = arith.constant 0 : i32
    %c0_i32_1 = arith.constant 0 : i32
    return %c0_i32, %c0_i32_0 : i32, i32
  }
  func.func @transform_8(%arg0: i32) -> (i32, i32) {
    %c0_i32 = arith.constant 0 : i32
    %c0_i32_0 = arith.constant 0 : i32
    %c0_i32_1 = arith.constant 0 : i32
    return %c0_i32, %c0_i32_0 : i32, i32
  }
}

</mosaic_0001>

<bundles_post_ra>
// kernel: tpu_custom_call.1
= control target key start
LH: loop header
LB: loop body
LE: loop exit
PB: predicated region body
PF: predicated region fallthrough
CT: control target
= control target key end

     0   :  { %s3510_s0 = inlined_call_operand.vmem [shape: f32[32,13], index: 0, kind: input, shape index: {}]   ;;  %s3511_s1 = inlined_call_operand.vmem [shape: f32[13,512], index: 1, kind: input, shape index: {}]   ;;  %s3512_s2 = inlined_call_operand.hbm [shape: f32[128,512], index: 2, kind: input, shape index: {}]   ;;  %s3513_s3 = inlined_call_operand.vmem [shape: f32[1,512], index: 3, kind: input, shape index: {}]   ;;  %s3514_s4 = inlined_call_operand.vmem [shape: f32[128,16], index: 4, kind: input, shape index: {}]   ;;  %s3515_s5 = inlined_call_operand.vmem [shape: f32[1,16], index: 5, kind: input, shape index: {}]   ;;  %s3516_s6 = inlined_call_operand.vmem [shape: f32[1,16], index: 6, kind: input, shape index: {}]   ;;  %s3517_s7 = inlined_call_operand.<no memory space> [shape: f32[1,1], index: 7, kind: input, shape index: {}]   ;;  %s3518_s8 = inlined_call_operand.vmem [shape: f32[32,1], index: 8, kind: output, shape index: {}]  }
   0x1   :  { %v13_v0 = vstv %s3517_s7 }
   0x2   :  { %14 = vst [vmem:[#allocation4] sm:$0x1] %v13_v0 }
   0x3   :  { %15 = vsyncpa [#allocation6], 0  ;;  %s2912_s29 = smov [#allocation5]   ;;  %s2888_s11 = scalar_lea.hbm %s3512_s2, 8192 }
   0x4   :  { %s25_s30 = sshll.u32 %s2912_s29, 4  ;;  %p2889_p0 = scmp.ne.s32.totalorder %s3512_s2, %s2888_s11  ;;  %s26_s30 = int_to_ptr.vmem [resolvable:$true] %s25_s30 }
   0x5   :  { %p2892_p1 = scmp.lt.u32.totalorder %s2888_s11, %s3512_s2 }
   0x7   :  { %p2894_p2 = pnand %p2892_p1, %p2889_p0 }
   0x9   :  { %2897 = shalt.err (!%p2894_p2)
}
   0xa   :  { %s2898_s7 = scalar_lea.vmem %s26_s30, 8192  ;;  %p2903_p4 = scmp.lt.s32.totalorder %s26_s30, %s26_s30 }
   0xb   :  { %p2899_p3 = scmp.ne.s32.totalorder %s26_s30, %s2898_s7  ;;  %p2904_p5 = scmp.lt.s32.totalorder %s2898_s7, %s2898_s7 }
   0xd   :  { %p2905_p6 = por %p2904_p5, %p2903_p4 }
   0xf   :  { %p2906_p7 = pnand %p2905_p6, %p2899_p3 }
  0x11   :  { %2909 = shalt.err (!%p2906_p7)
}
  0x12   :  { %s2913_s16 = smov 512   ;;  %s2914_s17 = smov 32  }
  0x13   :  { %31 = dma.hbm_to_vmem [thread:$0]  %s3512_s2, 8192, %s26_s30, [#allocation6], %s2913_s16, %s2913_s16, %s2914_s17  }
  0x14   :  { %2910 = dma.done.wait [#allocation6], 8192  }
  0x15   :  { %2911 = vsyncadd [#allocation6], 4294959104  ;;  %v2915_v1 = vmov 0.0   ;;  %vm92_vm0 = vcmask 1044480   ;;  %vm2916_vm1 = vmmov 1   ;;  %v50_v3 = vld [vmem:[%s3511_s1 + $0x8] sm:$0xff] }
  0x16   :  { %169 = vmatprep.mubr.f32.mxu1 %v2915_v1  ;;  %431 = vmatprep.mubr.f32.mxu0 %v2915_v1  ;;  %vm2979_vm2 = vmpackc.low %vm92_vm0, %vm2916_vm1  ;;  %v54_v4 = vld [vmem:[%s3511_s1 + $0x28] sm:$0x1f]  ;;  %v49_v8 = vld [vmem:[%s3511_s1] sm:$0xff]  ;;  %vm79_vm3 = vcmask 105472   ;;  %vm2020_vm4 = vcmask 130048   ;;  %vm2068_vm5 = vcmask 7168  }
  0x17   :  { %v300_v5 = vld [vmem:[#allocation5 + $0x8] sm:$0xff]  ;;  %v2151_v6 = vpack.c.bf16 %v54_v4, %v50_v3  ;;  %v53_v9 = vld [vmem:[%s3511_s1 + $0x20] sm:$0x1f]  ;;  %v52_v16 = vld [vmem:[%s3511_s1 + $0x18] sm:$0xff] }
  0x18   :  { %v304_v7 = vld [vmem:[#allocation5 + $0x28] sm:$0xff]  ;;  %v2154_v11 = vpack.c.bf16 %v53_v9, %v49_v8  ;;  %v299_v12 = vld [vmem:[#allocation5] sm:$0xff]  ;;  %v56_v17 = vld [vmem:[%s3511_s1 + $0x38] sm:$0x1f] }
  0x19   :  { %v2995_v10 = vpack.c.bf16 %v304_v7, %v300_v5  ;;  %v303_v13 = vld [vmem:[#allocation5 + $0x20] sm:$0xff]  ;;  %2153 = vmatprep.subr.msk.bf16.mxu1 %vm2979_vm2, %v2151_v6  ;;  %v308_v18 = vld [vmem:[#allocation5 + $0x48] sm:$0xff]  ;;  %v2157_v19 = vpack.c.bf16 %v56_v17, %v52_v16  ;;  %v302_v40 = vld [vmem:[#allocation5 + $0x18] sm:$0xff] }
  0x1a   :  { %v3000_v14 = vld [vmem:[%s3510_s0] sm:$0xff]  ;;  %v3004_v15 = vpack.c.bf16 %v303_v13, %v299_v12  ;;  %2156 = vmatpush1.bf16.msk.msra.mxu1 %vm2979_vm2, %v2154_v11  ;;  %v312_v20 = vld [vmem:[#allocation5 + $0x68] sm:$0xff]  ;;  %v3070_v52 = vld [vmem:[%s3510_s0 + $0x18] sm:$0xff] }
  0x1b   :  { %2164 = vmatprep.subr.bf16.mxu0 %v2995_v10  ;;  %v51_v21 = vld [vmem:[%s3511_s1 + $0x10] sm:$0xff]  ;;  %v3022_v23 = vpack.c.bf16 %v312_v20, %v308_v18  ;;  %v307_v25 = vld [vmem:[#allocation5 + $0x40] sm:$0xff]  ;;  %2159 = vmatprep.subr.msk.bf16.mxu1 %vm2979_vm2, %v2157_v19  ;;  %v306_v43 = vld [vmem:[#allocation5 + $0x38] sm:$0xff] }
  0x1c   :  { %v55_v22 = vld [vmem:[%s3511_s1 + $0x30] sm:$0x1f]  ;;  %2166 = vmatpush1.bf16.msra.mxu0 %v3004_v15  ;;  %v311_v26 = vld [vmem:[#allocation5 + $0x60] sm:$0xff]  ;;  %v3055_v45 = vpack.c.bf16 %v306_v43, %v302_v40  ;;  %v310_v59 = vld [vmem:[#allocation5 + $0x58] sm:$0xff] }
  0x1d   :  { %v2160_v24 = vpack.c.bf16 %v55_v22, %v51_v21  ;;  %v3026_v27 = vpack.c.bf16 %v311_v26, %v307_v25  ;;  %v316_v28 = vld [vmem:[#allocation5 + $0x88] sm:$0xff]  ;;  %v315_v30 = vld [vmem:[#allocation5 + $0x80] sm:$0xff]  ;;  %2080 = vmatmul.mubr.msk.f32.vlgmr.msra.gmra.mrb[0].mxu1 %vm79_vm3, %v3000_v14  ;;  %2168 = vmatprep.subr.bf16.mxu0 %v3022_v23  ;;  %v301_v54 = vld [vmem:[#allocation5 + $0x10] sm:$0xff] }
  0x1e   :  { %v320_v29 = vld [vmem:[#allocation5 + $0xa8] sm:$0xff]  ;;  %v319_v32 = vld [vmem:[#allocation5 + $0xa0] sm:$0xff]  ;;  %175 = vmatprep.mubr.f32.mxu1 %v2915_v1  ;;  %v305_v55 = vld [vmem:[#allocation5 + $0x30] sm:$0xff] }
  0x1f   :  { %v3031_v31 = vpack.c.bf16 %v320_v29, %v316_v28  ;;  %v324_v33 = vld [vmem:[#allocation5 + $0xc8] sm:$0xff]  ;;  %2162 = vmatpush1.bf16.msk.msra.mxu1 %vm2979_vm2, %v2160_v24  ;;  %v3042_v36 = vpack.c.bf16 %v319_v32, %v315_v30  ;;  %v323_v38 = vld [vmem:[#allocation5 + $0xc0] sm:$0xff]  ;;  %v314_v60 = vld [vmem:[#allocation5 + $0x78] sm:$0xff]  ;;  %v3081_v63 = vpack.c.bf16 %v305_v55, %v301_v54 }
  0x20   :  { %v3039_v34 = vld [vmem:[%s3510_s0 + $0x8] sm:$0xff]  ;;  %2170 = vmatpush1.bf16.msra.mxu0 %v3026_v27  ;;  %v3053_v44 = vld [vmem:[%s3510_s0 + $0x10] sm:$0xff]  ;;  %2196 = vmatprep.subr.bf16.mxu1 %v3055_v45  ;;  %v3086_v2 = vpack.c.bf16 %v314_v60, %v310_v59  ;;  %v318_v8 = vld [vmem:[#allocation5 + $0x98] sm:$0xff] }
  0x21   :  { %v328_v35 = vld [vmem:[#allocation5 + $0xe8] sm:$0xff]  ;;  %2172 = vmatprep.subr.bf16.mxu0 %v3031_v31  ;;  %v327_v39 = vld [vmem:[#allocation5 + $0xe0] sm:$0xff]  ;;  %2081 = vmatmul.mubr.msk.f32.gmra.mrb[2].mxu1 %vm79_vm3, %v3039_v34  ;;  %v309_v3 = vld [vmem:[#allocation5 + $0x50] sm:$0xff] }
  0x22   :  { %v3045_v37 = vpack.c.bf16 %v328_v35, %v324_v33  ;;  %v332_v41 = vld [vmem:[#allocation5 + $0x108] sm:$0xff]  ;;  %181 = vmatprep.mubr.f32.mxu1 %v2915_v1  ;;  %v3058_v46 = vpack.c.bf16 %v327_v39, %v323_v38  ;;  %v331_v48 = vld [vmem:[#allocation5 + $0x100] sm:$0xff]  ;;  %v313_v4 = vld [vmem:[#allocation5 + $0x70] sm:$0xff] }
  0x23   :  { %v336_v42 = vld [vmem:[#allocation5 + $0x128] sm:$0xff]  ;;  %v335_v49 = vld [vmem:[#allocation5 + $0x120] sm:$0xff]  ;;  %v322_v9 = vld [vmem:[#allocation5 + $0xb8] sm:$0xff]  ;;  %v3094_v13 = vpack.c.bf16 %v313_v4, %v309_v3  ;;  %v59_v4 = vlaneseq }
  0x24   :  { %2174 = vmatpush1.bf16.msra.mxu0 %v3042_v36  ;;  %v3061_v47 = vpack.c.bf16 %v336_v42, %v332_v41  ;;  %v340_v50 = vld [vmem:[#allocation5 + $0x148] sm:$0xff]  ;;  %v3073_v53 = vpack.c.bf16 %v335_v49, %v331_v48  ;;  %v339_v56 = vld [vmem:[#allocation5 + $0x140] sm:$0xff]  ;;  %v3101_v17 = vpack.c.bf16 %v322_v9, %v318_v8  ;;  %v317_v18 = vld [vmem:[#allocation5 + $0x90] sm:$0xff] }
  0x25   :  { %2176 = vmatprep.subr.bf16.mxu0 %v3045_v37  ;;  %2082 = vmatmul.mubr.msk.f32.gmra.mrb[4].mxu1 %vm79_vm3, %v3053_v44  ;;  %v344_v51 = vld [vmem:[#allocation5 + $0x168] sm:$0xff]  ;;  %v343_v58 = vld [vmem:[#allocation5 + $0x160] sm:$0xff]  ;;  %v321_v19 = vld [vmem:[#allocation5 + $0xb0] sm:$0xff] }
  0x26   :  { %187 = vmatprep.mubr.f32.mxu1 %v2915_v1  ;;  %v3076_v57 = vpack.c.bf16 %v344_v51, %v340_v50  ;;  %v348_v61 = vld [vmem:[#allocation5 + $0x188] sm:$0xff]  ;;  %v3084_v0 = vpack.c.bf16 %v343_v58, %v339_v56  ;;  %v347_v5 = vld [vmem:[#allocation5 + $0x180] sm:$0xff]  ;;  %v326_v22 = vld [vmem:[#allocation5 + $0xd8] sm:$0xff]  ;;  %v3109_v25 = vpack.c.bf16 %v321_v19, %v317_v18 }
  0x27   :  { %v352_v62 = vld [vmem:[#allocation5 + $0x1a8] sm:$0xff]  ;;  %v351_v7 = vld [vmem:[#allocation5 + $0x1a0] sm:$0xff]  ;;  %v330_v24 = vld [vmem:[#allocation5 + $0xf8] sm:$0xff] }
  0x28   :  { %2178 = vmatpush1.bf16.msra.mxu0 %v3058_v46  ;;  %v3089_v6 = vpack.c.bf16 %v352_v62, %v348_v61  ;;  %v356_v11 = vld [vmem:[#allocation5 + $0x1c8] sm:$0xff]  ;;  %v3099_v16 = vpack.c.bf16 %v351_v7, %v347_v5  ;;  %v355_v20 = vld [vmem:[#allocation5 + $0x1c0] sm:$0xff]  ;;  %v3116_v28 = vpack.c.bf16 %v330_v24, %v326_v22  ;;  %v325_v29 = vld [vmem:[#allocation5 + $0xd0] sm:$0xff]  ;;  %v60_v5 = vshrl.u32 %v59_v4, 7 }
  0x29   :  { %2180 = vmatprep.subr.bf16.mxu0 %v3061_v47  ;;  %2083 = vmatmul.mubr.msk.f32.gmra.mrb[6].mxu1 %vm79_vm3, %v3070_v52  ;;  %v360_v12 = vld [vmem:[#allocation5 + $0x1e8] sm:$0xff]  ;;  %v359_v21 = vld [vmem:[#allocation5 + $0x1e0] sm:$0xff]  ;;  %v329_v30 = vld [vmem:[#allocation5 + $0xf0] sm:$0xff] }
  0x2a   :  { %258 = vmatprep.mubr.f32.mxu1 %v2915_v1  ;;  %v3114_v26 = vpack.c.bf16 %v359_v21, %v355_v20  ;;  %v334_v32 = vld [vmem:[#allocation5 + $0x118] sm:$0xff]  ;;  %v333_v38 = vld [vmem:[#allocation5 + $0x110] sm:$0xff]  ;;  %v61_v7 = vsub.s32 0, %v60_v5  ;;  %v65_v9 = vsub.s32 1, %v60_v5 }
  0x2b   :  { %v338_v33 = vld [vmem:[#allocation5 + $0x138] sm:$0xff]  ;;  %v337_v39 = vld [vmem:[#allocation5 + $0x130] sm:$0xff] }
  0x2c   :  { %2182 = vmatpush1.bf16.msra.mxu0 %v3073_v53  ;;  %v3127_v35 = vpack.c.bf16 %v338_v33, %v334_v32  ;;  %v342_v40 = vld [vmem:[#allocation5 + $0x158] sm:$0xff]  ;;  %v3134_v42 = vpack.c.bf16 %v337_v39, %v333_v38  ;;  %v345_v48 = vld [vmem:[#allocation5 + $0x170] sm:$0xff]  ;;  %v69_v39 = vsub.s32 2, %v60_v5 }
  0x2d   :  { %2184 = vmatprep.subr.bf16.mxu0 %v3076_v57  ;;  %2086 = vmatmul.mubr.msk.f32.vlgmr.msra.gmra.mrb[8].mxu1 %vm79_vm3, %v3000_v14  ;;  %v3104_v14 = vpack.c.bf16 %v360_v12, %v356_v11  ;;  %v346_v41 = vld [vmem:[#allocation5 + $0x178] sm:$0xff]  ;;  %v349_v54 = vld [vmem:[#allocation5 + $0x190] sm:$0xff] }
  0x2e   :  { %2198 = vmatpush1.bf16.msra.mxu1 %v3081_v63  ;;  %264 = vmatprep.mubr.f32.mxu1 %v2915_v1  ;;  %v3137_v43 = vpack.c.bf16 %v346_v41, %v342_v40  ;;  %v350_v49 = vld [vmem:[#allocation5 + $0x198] sm:$0xff]  ;;  %v353_v55 = vld [vmem:[#allocation5 + $0x1b0] sm:$0xff]  ;;  %v73_v41 = vsub.s32 3, %v60_v5 }
  0x2f   :  { %2200 = vmatprep.subr.bf16.mxu1 %v3086_v2  ;;  %v354_v50 = vld [vmem:[#allocation5 + $0x1b8] sm:$0xff]  ;;  %v3152_v59 = vpack.c.bf16 %v353_v55, %v349_v54  ;;  %v357_v61 = vld [vmem:[#allocation5 + $0x1d0] sm:$0xff] }
  0x30   :  { %2186 = vmatpush1.bf16.msra.mxu0 %v3084_v0  ;;  %v358_v56 = vld [vmem:[#allocation5 + $0x1d8] sm:$0xff]  ;;  %v361_v62 = vld [vmem:[#allocation5 + $0x1f0] sm:$0xff] }
  0x31   :  { %2188 = vmatprep.subr.bf16.mxu0 %v3089_v6  ;;  %2087 = vmatmul.mubr.msk.f32.gmra.mrb[10].mxu1 %vm79_vm3, %v3039_v34  ;;  %v3122_v34 = vpack.c.bf16 %v329_v30, %v325_v29  ;;  %v362_v58 = vld [vmem:[#allocation5 + $0x1f8] sm:$0xff]  ;;  %v3160_v3 = vpack.c.bf16 %v361_v62, %v357_v61 }
  0x32   :  { %2202 = vmatpush1.bf16.msra.mxu1 %v3094_v13  ;;  %270 = vmatprep.mubr.f32.mxu1 %v2915_v1  ;;  %v3155_v60 = vpack.c.bf16 %v362_v58, %v358_v56  ;;  %v57_v8 = vld [vmem:[%s3513_s3] sm:$0xf] }
  0x33   :  { %2204 = vmatprep.subr.bf16.mxu1 %v3101_v17  ;;  %v62_v11 = vrot.slane %v57_v8, %v61_v7  ;;  %v66_v12 = vrot.slane %v57_v8, %v65_v9  ;;  %v74_v55 = vrot.slane %v57_v8, %v73_v41 }
  0x34   :  { %2190 = vmatpush1.bf16.msra.mxu0 %v3099_v16 }
  0x35   :  { %2192 = vmatprep.subr.bf16.mxu0 %v3104_v14  ;;  %2088 = vmatmul.mubr.msk.f32.gmra.mrb[12].mxu1 %vm79_vm3, %v3053_v44  ;;  %v341_v44 = vld [vmem:[#allocation5 + $0x150] sm:$0xff] }
  0x36   :  { %2206 = vmatpush1.bf16.msra.mxu1 %v3109_v25  ;;  %276 = vmatprep.mubr.f32.mxu1 %v2915_v1  ;;  %v3144_v51 = vpack.c.bf16 %v345_v48, %v341_v44 }
  0x37   :  { %2208 = vmatprep.subr.bf16.mxu1 %v3116_v28 }
  0x38   :  { %2194 = vmatpush1.bf16.msra.mxu0 %v3114_v26 }
  0x39   :  { %2228 = vmatprep.subr.bf16.mxu0 %v2995_v10  ;;  %2089 = vmatmul.mubr.msk.f32.gmra.mrb[14].mxu1 %vm79_vm3, %v3070_v52  ;;  %v3147_v52 = vpack.c.bf16 %v354_v50, %v350_v49  ;;  %v70_v50 = vrot.slane %v57_v8, %v69_v39 }
  0x3a   :  { %2210 = vmatpush1.bf16.msra.mxu1 %v3122_v34  ;;  %502 = vmatprep.mubr.f32.mxu1 %v2915_v1 }
  0x3b   :  { %432 = vmatmul.mubr.f32.vlgmr.msra.gmra.mrb[0].mxu0 %v2915_v1  ;;  %2212 = vmatprep.subr.bf16.mxu1 %v3127_v35 }
  0x3c   :  { %2230 = vmatpush1.bf16.msra.mxu0 %v3004_v15  ;;  %606 = vmatprep.mubr.f32.mxu0 %v2915_v1 }
  0x3d   :  { %2232 = vmatprep.subr.bf16.mxu0 %v3022_v23 }
  0x3e   :  { %2214 = vmatpush1.bf16.msra.mxu1 %v3134_v42 }
  0x3f   :  { %2216 = vmatprep.subr.bf16.mxu1 %v3137_v43 }
  0x40   :  { %2234 = vmatpush1.bf16.msra.mxu0 %v3026_v27 }
  0x41   :  { %2236 = vmatprep.subr.bf16.mxu0 %v3031_v31 }
  0x42   :  { %2218 = vmatpush1.bf16.msra.mxu1 %v3144_v51 }
  0x43   :  { %2220 = vmatprep.subr.bf16.mxu1 %v3147_v52 }
  0x44   :  { %2238 = vmatpush1.bf16.msra.mxu0 %v3042_v36 }
  0x45   :  { %2240 = vmatprep.subr.bf16.mxu0 %v3045_v37 }
  0x46   :  { %2222 = vmatpush1.bf16.msra.mxu1 %v3152_v59 }
  0x47   :  { %2224 = vmatprep.subr.bf16.mxu1 %v3155_v60 }
  0x48   :  { %2242 = vmatpush1.bf16.msra.mxu0 %v3058_v46 }
  0x49   :  { %2244 = vmatprep.subr.bf16.mxu0 %v3061_v47 }
  0x4a   :  { %2226 = vmatpush1.bf16.msra.mxu1 %v3160_v3 }
  0x4b   :  { %2260 = vmatprep.subr.bf16.mxu1 %v3055_v45 }
  0x4c   :  { %2246 = vmatpush1.bf16.msra.mxu0 %v3073_v53 }
  0x4d   :  { %503 = vmatmul.mubr.f32.vlgmr.msra.gmra.mrb[16].mxu1 %v2915_v1  ;;  %2248 = vmatprep.subr.bf16.mxu0 %v3076_v57 }
  0x4e   :  { %2262 = vmatpush1.bf16.msra.mxu1 %v3081_v63  ;;  %677 = vmatprep.mubr.f32.mxu1 %v2915_v1 }
  0x4f   :  { %2264 = vmatprep.subr.bf16.mxu1 %v3086_v2 }
  0x50   :  { %2250 = vmatpush1.bf16.msra.mxu0 %v3084_v0 }
  0x51   :  { %2252 = vmatprep.subr.bf16.mxu0 %v3089_v6 }
  0x52   :  { %2266 = vmatpush1.bf16.msra.mxu1 %v3094_v13 }
  0x53   :  { %2268 = vmatprep.subr.bf16.mxu1 %v3101_v17 }
  0x54   :  { %2254 = vmatpush1.bf16.msra.mxu0 %v3099_v16 }
  0x55   :  { %2256 = vmatprep.subr.bf16.mxu0 %v3104_v14 }
  0x56   :  { %2270 = vmatpush1.bf16.msra.mxu1 %v3109_v25 }
  0x57   :  { %2272 = vmatprep.subr.bf16.mxu1 %v3116_v28 }
  0x58   :  { %2258 = vmatpush1.bf16.msra.mxu0 %v3114_v26 }
  0x59   :  { %2292 = vmatprep.subr.bf16.mxu0 %v2995_v10 }
  0x5a   :  { %2274 = vmatpush1.bf16.msra.mxu1 %v3122_v34 }
  0x5b   :  { %2276 = vmatprep.subr.bf16.mxu1 %v3127_v35 }
  0x5e   :  { %2278 = vmatpush1.bf16.msra.mxu1 %v3134_v42 }
  0x5f   :  { %2280 = vmatprep.subr.bf16.mxu1 %v3137_v43 }
  0x62   :  { %2282 = vmatpush1.bf16.msra.mxu1 %v3144_v51 }
  0x63   :  { %2284 = vmatprep.subr.bf16.mxu1 %v3147_v52 }
  0x66   :  { %2286 = vmatpush1.bf16.msra.mxu1 %v3152_v59 }
  0x67   :  { %2288 = vmatprep.subr.bf16.mxu1 %v3155_v60 }
  0x6a   :  { %2290 = vmatpush1.bf16.msra.mxu1 %v3160_v3 }
  0x6b   :  { %2324 = vmatprep.subr.bf16.mxu1 %v3055_v45 }
  0xf0   :  { %v171_v18 = vpop.f32.mrb[0].mxu1 }
  0xf1   :  { %v172_v19 = vadd.f32 %v171_v18, %v62_v11  ;;  %v173_v20 = vpop.f32.mrb[1].mxu1 }
  0xf2   :  { %v174_v21 = vadd.f32 %v173_v20, %v66_v12 }
  0xf3   :  { %283 = vst [vmem:[#allocation2] sm:$0xff] %v172_v19 }
  0xf4   :  { %284 = vst [vmem:[#allocation2 + $0x8] sm:$0xff] %v174_v21  ;;  %v177_v22 = vpop.f32.mrb[2].mxu1 }
  0xf5   :  { %v178_v24 = vadd.f32 %v177_v22, %v62_v11  ;;  %v179_v29 = vpop.f32.mrb[3].mxu1 }
  0xf6   :  { %v180_v30 = vadd.f32 %v179_v29, %v66_v12 }
  0xf7   :  { %287 = vst [vmem:[#allocation2 + $0x20] sm:$0xff] %v178_v24 }
  0xf8   :  { %288 = vst [vmem:[#allocation2 + $0x28] sm:$0xff] %v180_v30  ;;  %v183_v32 = vpop.f32.mrb[4].mxu1 }
  0xf9   :  { %v184_v33 = vadd.f32 %v183_v32, %v62_v11  ;;  %v185_v38 = vpop.f32.mrb[5].mxu1 }
  0xfa   :  { %v186_v40 = vadd.f32 %v185_v38, %v66_v12 }
  0xfb   :  { %291 = vst [vmem:[#allocation2 + $0x40] sm:$0xff] %v184_v33  ;;  %v364_v30 = vld [vmem:[#allocation2 + $0x8] sm:$0xf] }
  0xfc   :  { %292 = vst [vmem:[#allocation2 + $0x48] sm:$0xff] %v186_v40  ;;  %v189_v44 = vpop.f32.mrb[6].mxu1 }
  0xfd   :  { %v190_v48 = vadd.f32 %v189_v44, %v62_v11  ;;  %v191_v49 = vpop.f32.mrb[7].mxu1 }
  0xfe   :  { %v192_v54 = vadd.f32 %v191_v49, %v66_v12  ;;  %v363_v12 = vld [vmem:[#allocation2] sm:$0xf] }
  0xff   :  { %295 = vst [vmem:[#allocation2 + $0x60] sm:$0xff] %v190_v48 }
 0x100   :  { %296 = vst [vmem:[#allocation2 + $0x68] sm:$0xff] %v192_v54  ;;  %v260_v56 = vpop.f32.mrb[8].mxu1 }
 0x101   :  { %v261_v58 = vadd.f32 %v260_v56, %v70_v50  ;;  %v262_v61 = vpop.f32.mrb[9].mxu1 }
 0x102   :  { %v263_v62 = vadd.f32 %v262_v61, %v74_v55 }
 0x103   :  { %285 = vst [vmem:[#allocation2 + $0x10] sm:$0xff] %v261_v58 }
 0x104   :  { %286 = vst [vmem:[#allocation2 + $0x18] sm:$0xff] %v263_v62  ;;  %v266_v4 = vpop.f32.mrb[10].mxu1 }
 0x105   :  { %v267_v7 = vadd.f32 %v266_v4, %v70_v50  ;;  %v268_v9 = vpop.f32.mrb[11].mxu1 }
 0x106   :  { %v269_v5 = vadd.f32 %v268_v9, %v74_v55 }
 0x107   :  { %289 = vst [vmem:[#allocation2 + $0x30] sm:$0xff] %v267_v7 }
 0x108   :  { %290 = vst [vmem:[#allocation2 + $0x38] sm:$0xff] %v269_v5  ;;  %v272_v18 = vpop.f32.mrb[12].mxu1 }
 0x109   :  { %v273_v11 = vadd.f32 %v272_v18, %v70_v50  ;;  %v274_v19 = vpop.f32.mrb[13].mxu1 }
 0x10a   :  { %v275_v20 = vadd.f32 %v274_v19, %v74_v55  ;;  %v365_v58 = vld [vmem:[#allocation2 + $0x10] sm:$0xf] }
 0x10b   :  { %293 = vst [vmem:[#allocation2 + $0x50] sm:$0xff] %v273_v11  ;;  %v366_v62 = vld [vmem:[#allocation2 + $0x18] sm:$0xf] }
 0x10c   :  { %294 = vst [vmem:[#allocation2 + $0x58] sm:$0xff] %v275_v20  ;;  %v278_v8 = vpop.f32.mrb[14].mxu1 }
 0x10d   :  { %v279_v22 = vadd.f32 %v278_v8, %v70_v50  ;;  %v280_v24 = vpop.f32.mrb[15].mxu1 }
 0x10e   :  { %v433_v21 = vpop.f32.mrb[0].mxu0  ;;  %v281_v33 = vadd.f32 %v280_v24, %v74_v55 }
 0x10f   :  { %v509_v29 = vadd.f32 %v433_v21, %v363_v12  ;;  %v435_v32 = vpop.f32.mrb[1].mxu0  ;;  %297 = vst [vmem:[#allocation2 + $0x70] sm:$0xff] %v279_v22 }
 0x110   :  { %v510_v38 = vadd.f32 %v435_v32, %v364_v30  ;;  %298 = vst [vmem:[#allocation2 + $0x78] sm:$0xff] %v281_v33 }
 0x111   :  { %v513_v39 = vsub.f32 0.0, %v509_v29 }
 0x112   :  { %v519_v40 = vsub.f32 0.0, %v510_v38 }
 0x113   :  { %v514_v41 = vmul.f32 1.442695, %v513_v39 }
 0x114   :  { %v520_v44 = vmul.f32 1.442695, %v519_v40  ;;  %v538_v40 = vld [vmem:[#allocation2] sm:$0xf0] }
 0x115   :  { %2712 = vpow2.f32 %v514_v41 }
 0x116   :  { %2714 = vpow2.f32 %v520_v44 }
 0x11f   :  { %v2713_v48 = vpop.eup %2712 }
 0x120   :  { %v2715_v49 = vpop.eup %2714  ;;  %v516_v54 = vadd.f32 1.0, %v2713_v48  ;;  %v504_v50 = vpop.f32.mrb[16].mxu1  ;;  %v539_v48 = vld [vmem:[#allocation2 + $0x8] sm:$0xf0] }
 0x121   :  { %v522_v56 = vadd.f32 1.0, %v2715_v49  ;;  %v511_v61 = vadd.f32 %v504_v50, %v365_v58  ;;  %v506_v4 = vpop.f32.mrb[17].mxu1 }
 0x122   :  { %2716 = vrcp.f32 %v516_v54  ;;  %v512_v55 = vadd.f32 %v506_v4, %v366_v62 }
 0x123   :  { %2718 = vrcp.f32 %v522_v56 }
 0x124   :  { %2720 = vtanh.f32 %v511_v61  ;;  %v526_v7 = vsub.f32 0.0, %v512_v55  ;;  %v541_v61 = vld [vmem:[#allocation2 + $0x18] sm:$0xf0] }
 0x126   :  { %v527_v9 = vmul.f32 1.442695, %v526_v7 }
 0x128   :  { %2722 = vpow2.f32 %v527_v9  ;;  %v540_v9 = vld [vmem:[#allocation2 + $0x10] sm:$0xf0] }
 0x12c   :  { %v2717_v5 = vpop.eup %2716 }
 0x12d   :  { %v2719_v18 = vpop.eup %2718 }
 0x12e   :  { %v2721_v11 = vpop.eup %2720  ;;  %v532_v19 = vmul.f32 0.0, %v2719_v18 }
 0x12f   :  { %v533_v20 = vmul.f32 %v2721_v11, %v2717_v5 }
 0x131   :  { %v3196_v8 = vadd.f32 %v533_v20, %v532_v19 }
 0x132   :  { %v2723_v12 = vpop.eup %2722 }
 0x133   :  { %v529_v21 = vadd.f32 1.0, %v2723_v12  ;;  %2724 = vtanh.f32 %v3196_v8 }
 0x135   :  { %2726 = vrcp.f32 %v529_v21 }
 0x13d   :  { %v2725_v22 = vpop.eup %2724 }
 0x13f   :  { %v2727_v24 = vpop.eup %2726 }
 0x140   :  { %v536_v29 = vmul.f32 %v2727_v24, %v2725_v22 }
 0x142   :  { %537 = vst [vmem:[#allocation3] sm:$0xf] %v536_v29  ;;  %607 = vmatmul.mubr.f32.vlgmr.msra.gmra.mrb[2].mxu0 %v536_v29  ;;  %678 = vmatmul.mubr.f32.vlgmr.msra.gmra.mrb[18].mxu1 %v536_v29  ;;  %v720_v29 = vrot.slane %v3196_v8, 4  ;;  %v728_v8 = vld [vmem:[#allocation2 + $0x20] sm:$0xf] }
 0x143   :  { %2294 = vmatpush1.bf16.msra.mxu0 %v3004_v15  ;;  %2326 = vmatpush1.bf16.msra.mxu1 %v3081_v63 }
 0x144   :  { %2296 = vmatprep.subr.bf16.mxu0 %v3022_v23  ;;  %2328 = vmatprep.subr.bf16.mxu1 %v3086_v2 }
 0x145   :  { %799 = vmatprep.mubr.f32.mxu0 %v2915_v1  ;;  %870 = vmatprep.mubr.f32.mxu1 %v2915_v1 }
 0x147   :  { %2298 = vmatpush1.bf16.msra.mxu0 %v3026_v27  ;;  %2330 = vmatpush1.bf16.msra.mxu1 %v3094_v13 }
 0x148   :  { %2300 = vmatprep.subr.bf16.mxu0 %v3031_v31  ;;  %2332 = vmatprep.subr.bf16.mxu1 %v3101_v17 }
 0x14b   :  { %2302 = vmatpush1.bf16.msra.mxu0 %v3042_v36  ;;  %2334 = vmatpush1.bf16.msra.mxu1 %v3109_v25 }
 0x14c   :  { %2304 = vmatprep.subr.bf16.mxu0 %v3045_v37  ;;  %2336 = vmatprep.subr.bf16.mxu1 %v3116_v28 }
 0x14f   :  { %2306 = vmatpush1.bf16.msra.mxu0 %v3058_v46  ;;  %2338 = vmatpush1.bf16.msra.mxu1 %v3122_v34 }
 0x150   :  { %2308 = vmatprep.subr.bf16.mxu0 %v3061_v47  ;;  %2340 = vmatprep.subr.bf16.mxu1 %v3127_v35 }
 0x153   :  { %2310 = vmatpush1.bf16.msra.mxu0 %v3073_v53  ;;  %2342 = vmatpush1.bf16.msra.mxu1 %v3134_v42 }
 0x154   :  { %2312 = vmatprep.subr.bf16.mxu0 %v3076_v57  ;;  %2344 = vmatprep.subr.bf16.mxu1 %v3137_v43 }
 0x157   :  { %2314 = vmatpush1.bf16.msra.mxu0 %v3084_v0  ;;  %2346 = vmatpush1.bf16.msra.mxu1 %v3144_v51 }
 0x158   :  { %2316 = vmatprep.subr.bf16.mxu0 %v3089_v6  ;;  %2348 = vmatprep.subr.bf16.mxu1 %v3147_v52 }
 0x15b   :  { %2318 = vmatpush1.bf16.msra.mxu0 %v3099_v16  ;;  %2350 = vmatpush1.bf16.msra.mxu1 %v3152_v59 }
 0x15c   :  { %2320 = vmatprep.subr.bf16.mxu0 %v3104_v14  ;;  %2352 = vmatprep.subr.bf16.mxu1 %v3155_v60 }
 0x15f   :  { %2322 = vmatpush1.bf16.msra.mxu0 %v3114_v26  ;;  %2354 = vmatpush1.bf16.msra.mxu1 %v3160_v3 }
 0x160   :  { %2356 = vmatprep.subr.bf16.mxu0 %v2995_v10  ;;  %2388 = vmatprep.subr.bf16.mxu1 %v3055_v45 }
 0x215   :  { %v608_v30 = vpop.f32.mrb[2].mxu0  ;;  %v679_v32 = vpop.f32.mrb[18].mxu1 }
 0x216   :  { %v688_v33 = vrot.slane %v608_v30, 4  ;;  %v610_v38 = vpop.f32.mrb[3].mxu0  ;;  %v681_v39 = vpop.f32.mrb[19].mxu1  ;;  %v690_v7 = vrot.slane %v679_v32, 4 }
 0x217   :  { %v689_v41 = vrot.slane %v610_v38, 4  ;;  %v691_v54 = vrot.slane %v681_v39, 4 }
 0x218   :  { %v696_v44 = vadd.f32 %v688_v33, %v538_v40  ;;  %v698_v18 = vadd.f32 %v690_v7, %v540_v9  ;;  %v731_v9 = vld [vmem:[#allocation2 + $0x38] sm:$0xf] }
 0x219   :  { %v697_v49 = vadd.f32 %v689_v41, %v539_v48  ;;  %v699_v4 = vadd.f32 %v691_v54, %v541_v61 }
 0x21a   :  { %v700_v56 = vsub.f32 0.0, %v696_v44 }
 0x21b   :  { %v706_v58 = vsub.f32 0.0, %v697_v49  ;;  %v713_v55 = vsub.f32 0.0, %v699_v4 }
 0x21c   :  { %v701_v50 = vmul.f32 1.442695, %v700_v56 }
 0x21d   :  { %v707_v62 = vmul.f32 1.442695, %v706_v58  ;;  %v714_v5 = vmul.f32 1.442695, %v713_v55  ;;  %v729_v58 = vld [vmem:[#allocation2 + $0x28] sm:$0xf] }
 0x21e   :  { %2728 = vpow2.f32 %v701_v50 }
 0x21f   :  { %2730 = vpow2.f32 %v707_v62 }
 0x220   :  { %2732 = vpow2.f32 %v714_v5 }
 0x221   :  { %2734 = vtanh.f32 %v698_v18 }
 0x228   :  { %v2729_v11 = vpop.eup %2728 }
 0x229   :  { %v2731_v19 = vpop.eup %2730  ;;  %v703_v20 = vadd.f32 1.0, %v2729_v11 }
 0x22a   :  { %v709_v12 = vadd.f32 1.0, %v2731_v19  ;;  %v2733_v21 = vpop.eup %2732  ;;  %v730_v19 = vld [vmem:[#allocation2 + $0x30] sm:$0xf] }
 0x22b   :  { %2736 = vrcp.f32 %v703_v20  ;;  %v2735_v22 = vpop.eup %2734  ;;  %v716_v38 = vadd.f32 1.0, %v2733_v21 }
 0x22c   :  { %2738 = vrcp.f32 %v709_v12 }
 0x22d   :  { %2740 = vrcp.f32 %v716_v38 }
 0x235   :  { %v2737_v24 = vpop.eup %2736 }
 0x236   :  { %v2739_v30 = vpop.eup %2738  ;;  %v723_v33 = vmul.f32 %v2737_v24, %v2735_v22 }
 0x237   :  { %v722_v32 = vmul.f32 %v2739_v30, %v720_v29  ;;  %v2741_v40 = vpop.eup %2740 }
 0x239   :  { %v3234_v39 = vadd.f32 %v723_v33, %v722_v32 }
 0x23b   :  { %2742 = vtanh.f32 %v3234_v39  ;;  %v901_v32 = vrot.slane %v3234_v39, 4 }
 0x245   :  { %v2743_v41 = vpop.eup %2742 }
 0x246   :  { %v726_v44 = vmul.f32 %v2743_v41, %v2741_v40 }
 0x248   :  { %727 = vst [vmem:[#allocation3] sm:$0xf0] %v726_v44  ;;  %v733_v48 = vrot.slane %v726_v44, 4 }
 0x24a   :  { %800 = vmatmul.mubr.f32.vlgmr.msra.gmra.mrb[4].mxu0 %v733_v48  ;;  %871 = vmatmul.mubr.f32.vlgmr.msra.gmra.mrb[20].mxu1 %v733_v48 }
 0x24b   :  { %2358 = vmatpush1.bf16.msra.mxu0 %v3004_v15  ;;  %2390 = vmatpush1.bf16.msra.mxu1 %v3081_v63 }
 0x24c   :  { %2360 = vmatprep.subr.bf16.mxu0 %v3022_v23  ;;  %2392 = vmatprep.subr.bf16.mxu1 %v3086_v2 }
 0x24d   :  { %977 = vmatprep.mubr.f32.mxu0 %v2915_v1  ;;  %1048 = vmatprep.mubr.f32.mxu1 %v2915_v1 }
 0x24f   :  { %2362 = vmatpush1.bf16.msra.mxu0 %v3026_v27  ;;  %2394 = vmatpush1.bf16.msra.mxu1 %v3094_v13 }
 0x250   :  { %2364 = vmatprep.subr.bf16.mxu0 %v3031_v31  ;;  %2396 = vmatprep.subr.bf16.mxu1 %v3101_v17 }
 0x253   :  { %2366 = vmatpush1.bf16.msra.mxu0 %v3042_v36  ;;  %2398 = vmatpush1.bf16.msra.mxu1 %v3109_v25 }
 0x254   :  { %2368 = vmatprep.subr.bf16.mxu0 %v3045_v37  ;;  %2400 = vmatprep.subr.bf16.mxu1 %v3116_v28 }
 0x257   :  { %2370 = vmatpush1.bf16.msra.mxu0 %v3058_v46  ;;  %2402 = vmatpush1.bf16.msra.mxu1 %v3122_v34 }
 0x258   :  { %2372 = vmatprep.subr.bf16.mxu0 %v3061_v47  ;;  %2404 = vmatprep.subr.bf16.mxu1 %v3127_v35 }
 0x25b   :  { %2374 = vmatpush1.bf16.msra.mxu0 %v3073_v53  ;;  %2406 = vmatpush1.bf16.msra.mxu1 %v3134_v42 }
 0x25c   :  { %2376 = vmatprep.subr.bf16.mxu0 %v3076_v57  ;;  %2408 = vmatprep.subr.bf16.mxu1 %v3137_v43 }
 0x25f   :  { %2378 = vmatpush1.bf16.msra.mxu0 %v3084_v0  ;;  %2410 = vmatpush1.bf16.msra.mxu1 %v3144_v51 }
 0x260   :  { %2380 = vmatprep.subr.bf16.mxu0 %v3089_v6  ;;  %2412 = vmatprep.subr.bf16.mxu1 %v3147_v52 }
 0x263   :  { %2382 = vmatpush1.bf16.msra.mxu0 %v3099_v16  ;;  %2414 = vmatpush1.bf16.msra.mxu1 %v3152_v59 }
 0x264   :  { %2384 = vmatprep.subr.bf16.mxu0 %v3104_v14  ;;  %2416 = vmatprep.subr.bf16.mxu1 %v3155_v60 }
 0x267   :  { %2386 = vmatpush1.bf16.msra.mxu0 %v3114_v26  ;;  %2418 = vmatpush1.bf16.msra.mxu1 %v3160_v3 }
 0x268   :  { %2420 = vmatprep.subr.bf16.mxu0 %v2995_v10  ;;  %2452 = vmatprep.subr.bf16.mxu1 %v3055_v45 }
 0x31d   :  { %v801_v49 = vpop.f32.mrb[4].mxu0  ;;  %v872_v54 = vpop.f32.mrb[20].mxu1 }
 0x31e   :  { %v877_v56 = vadd.f32 %v801_v49, %v728_v8  ;;  %v803_v50 = vpop.f32.mrb[5].mxu0  ;;  %v874_v61 = vpop.f32.mrb[21].mxu1  ;;  %v879_v12 = vadd.f32 %v872_v54, %v730_v19 }
 0x31f   :  { %v878_v62 = vadd.f32 %v803_v50, %v729_v58  ;;  %v880_v18 = vadd.f32 %v874_v61, %v731_v9  ;;  %v910_v9 = vld [vmem:[#allocation2 + $0x28] sm:$0xf0] }
 0x320   :  { %v881_v4 = vsub.f32 0.0, %v877_v56 }
 0x321   :  { %v887_v55 = vsub.f32 0.0, %v878_v62  ;;  %v894_v11 = vsub.f32 0.0, %v880_v18 }
 0x322   :  { %v882_v7 = vmul.f32 1.442695, %v881_v4  ;;  %v909_v4 = vld [vmem:[#allocation2 + $0x20] sm:$0xf0] }
 0x323   :  { %v888_v5 = vmul.f32 1.442695, %v887_v55  ;;  %v895_v20 = vmul.f32 1.442695, %v894_v11 }
 0x324   :  { %2744 = vpow2.f32 %v882_v7 }
 0x325   :  { %2746 = vpow2.f32 %v888_v5 }
 0x326   :  { %2748 = vpow2.f32 %v895_v20 }
 0x327   :  { %2750 = vtanh.f32 %v879_v12  ;;  %v912_v12 = vld [vmem:[#allocation2 + $0x38] sm:$0xf0] }
 0x32e   :  { %v2745_v21 = vpop.eup %2744 }
 0x32f   :  { %v2747_v22 = vpop.eup %2746  ;;  %v884_v24 = vadd.f32 1.0, %v2745_v21 }
 0x330   :  { %v890_v29 = vadd.f32 1.0, %v2747_v22  ;;  %v2749_v30 = vpop.eup %2748 }
 0x331   :  { %2752 = vrcp.f32 %v884_v24  ;;  %v2751_v33 = vpop.eup %2750  ;;  %v897_v44 = vadd.f32 1.0, %v2749_v30  ;;  %v911_v30 = vld [vmem:[#allocation2 + $0x30] sm:$0xf0] }
 0x332   :  { %2754 = vrcp.f32 %v890_v29 }
 0x333   :  { %2756 = vrcp.f32 %v897_v44 }
 0x33b   :  { %v2753_v38 = vpop.eup %2752 }
 0x33c   :  { %v2755_v40 = vpop.eup %2754  ;;  %v904_v41 = vmul.f32 %v2753_v38, %v2751_v33 }
 0x33d   :  { %v903_v48 = vmul.f32 %v2755_v40, %v901_v32  ;;  %v2757_v49 = vpop.eup %2756 }
 0x33f   :  { %v3272_v8 = vadd.f32 %v904_v41, %v903_v48 }
 0x341   :  { %2758 = vtanh.f32 %v3272_v8 }
 0x34b   :  { %v2759_v54 = vpop.eup %2758 }
 0x34c   :  { %v907_v56 = vmul.f32 %v2759_v54, %v2757_v49 }
 0x34e   :  { %908 = vst [vmem:[#allocation3 + $0x8] sm:$0xf] %v907_v56  ;;  %978 = vmatmul.mubr.f32.vlgmr.msra.gmra.mrb[6].mxu0 %v907_v56  ;;  %1049 = vmatmul.mubr.f32.vlgmr.msra.gmra.mrb[22].mxu1 %v907_v56  ;;  %v1091_v56 = vrot.slane %v3272_v8, 4  ;;  %v1099_v8 = vld [vmem:[#allocation2 + $0x40] sm:$0xf] }
 0x34f   :  { %2422 = vmatpush1.bf16.msra.mxu0 %v3004_v15  ;;  %2454 = vmatpush1.bf16.msra.mxu1 %v3081_v63 }
 0x350   :  { %2424 = vmatprep.subr.bf16.mxu0 %v3022_v23  ;;  %2456 = vmatprep.subr.bf16.mxu1 %v3086_v2 }
 0x351   :  { %1170 = vmatprep.mubr.f32.mxu0 %v2915_v1  ;;  %1241 = vmatprep.mubr.f32.mxu1 %v2915_v1 }
 0x353   :  { %2426 = vmatpush1.bf16.msra.mxu0 %v3026_v27  ;;  %2458 = vmatpush1.bf16.msra.mxu1 %v3094_v13 }
 0x354   :  { %2428 = vmatprep.subr.bf16.mxu0 %v3031_v31  ;;  %2460 = vmatprep.subr.bf16.mxu1 %v3101_v17 }
 0x357   :  { %2430 = vmatpush1.bf16.msra.mxu0 %v3042_v36  ;;  %2462 = vmatpush1.bf16.msra.mxu1 %v3109_v25 }
 0x358   :  { %2432 = vmatprep.subr.bf16.mxu0 %v3045_v37  ;;  %2464 = vmatprep.subr.bf16.mxu1 %v3116_v28 }
 0x35b   :  { %2434 = vmatpush1.bf16.msra.mxu0 %v3058_v46  ;;  %2466 = vmatpush1.bf16.msra.mxu1 %v3122_v34 }
 0x35c   :  { %2436 = vmatprep.subr.bf16.mxu0 %v3061_v47  ;;  %2468 = vmatprep.subr.bf16.mxu1 %v3127_v35 }
 0x35f   :  { %2438 = vmatpush1.bf16.msra.mxu0 %v3073_v53  ;;  %2470 = vmatpush1.bf16.msra.mxu1 %v3134_v42 }
 0x360   :  { %2440 = vmatprep.subr.bf16.mxu0 %v3076_v57  ;;  %2472 = vmatprep.subr.bf16.mxu1 %v3137_v43 }
 0x363   :  { %2442 = vmatpush1.bf16.msra.mxu0 %v3084_v0  ;;  %2474 = vmatpush1.bf16.msra.mxu1 %v3144_v51 }
 0x364   :  { %2444 = vmatprep.subr.bf16.mxu0 %v3089_v6  ;;  %2476 = vmatprep.subr.bf16.mxu1 %v3147_v52 }
 0x367   :  { %2446 = vmatpush1.bf16.msra.mxu0 %v3099_v16  ;;  %2478 = vmatpush1.bf16.msra.mxu1 %v3152_v59 }
 0x368   :  { %2448 = vmatprep.subr.bf16.mxu0 %v3104_v14  ;;  %2480 = vmatprep.subr.bf16.mxu1 %v3155_v60 }
 0x36b   :  { %2450 = vmatpush1.bf16.msra.mxu0 %v3114_v26  ;;  %2482 = vmatpush1.bf16.msra.mxu1 %v3160_v3 }
 0x36c   :  { %2484 = vmatprep.subr.bf16.mxu0 %v2995_v10  ;;  %2516 = vmatprep.subr.bf16.mxu1 %v3055_v45 }
 0x421   :  { %v979_v39 = vpop.f32.mrb[6].mxu0  ;;  %v1050_v58 = vpop.f32.mrb[22].mxu1 }
 0x422   :  { %v1059_v50 = vrot.slane %v979_v39, 4  ;;  %v981_v61 = vpop.f32.mrb[7].mxu0  ;;  %v1052_v62 = vpop.f32.mrb[23].mxu1  ;;  %v1061_v29 = vrot.slane %v1050_v58, 4 }
 0x423   :  { %v1060_v55 = vrot.slane %v981_v61, 4  ;;  %v1062_v18 = vrot.slane %v1052_v62, 4 }
 0x424   :  { %v1067_v7 = vadd.f32 %v1059_v50, %v909_v4  ;;  %v1069_v38 = vadd.f32 %v1061_v29, %v911_v30  ;;  %v1102_v30 = vld [vmem:[#allocation2 + $0x58] sm:$0xf] }
 0x425   :  { %v1068_v5 = vadd.f32 %v1060_v55, %v910_v9  ;;  %v1070_v22 = vadd.f32 %v1062_v18, %v912_v12 }
 0x426   :  { %v1071_v11 = vsub.f32 0.0, %v1067_v7 }
 0x427   :  { %v1077_v19 = vsub.f32 0.0, %v1068_v5  ;;  %v1084_v24 = vsub.f32 0.0, %v1070_v22 }
 0x428   :  { %v1072_v20 = vmul.f32 1.442695, %v1071_v11 }
 0x429   :  { %v1078_v21 = vmul.f32 1.442695, %v1077_v19  ;;  %v1085_v33 = vmul.f32 1.442695, %v1084_v24  ;;  %v1100_v19 = vld [vmem:[#allocation2 + $0x48] sm:$0xf] }
 0x42a   :  { %2760 = vpow2.f32 %v1072_v20 }
 0x42b   :  { %2762 = vpow2.f32 %v1078_v21 }
 0x42c   :  { %2764 = vpow2.f32 %v1085_v33 }
 0x42d   :  { %2766 = vtanh.f32 %v1069_v38 }
 0x434   :  { %v2761_v32 = vpop.eup %2760 }
 0x435   :  { %v2763_v40 = vpop.eup %2762  ;;  %v1074_v41 = vadd.f32 1.0, %v2761_v32 }
 0x436   :  { %v1080_v44 = vadd.f32 1.0, %v2763_v40  ;;  %v2765_v48 = vpop.eup %2764  ;;  %v1101_v40 = vld [vmem:[#allocation2 + $0x50] sm:$0xf] }
 0x437   :  { %2768 = vrcp.f32 %v1074_v41  ;;  %v2767_v49 = vpop.eup %2766  ;;  %v1087_v61 = vadd.f32 1.0, %v2765_v48 }
 0x438   :  { %2770 = vrcp.f32 %v1080_v44 }
 0x439   :  { %2772 = vrcp.f32 %v1087_v61 }
 0x441   :  { %v2769_v54 = vpop.eup %2768 }
 0x442   :  { %v2771_v39 = vpop.eup %2770  ;;  %v1094_v50 = vmul.f32 %v2769_v54, %v2767_v49 }
 0x443   :  { %v1093_v58 = vmul.f32 %v2771_v39, %v1091_v56  ;;  %v2773_v4 = vpop.eup %2772 }
 0x445   :  { %v3310_v62 = vadd.f32 %v1094_v50, %v1093_v58 }
 0x447   :  { %2774 = vtanh.f32 %v3310_v62  ;;  %v1272_v58 = vrot.slane %v3310_v62, 4 }
 0x451   :  { %v2775_v55 = vpop.eup %2774 }
 0x452   :  { %v1097_v7 = vmul.f32 %v2775_v55, %v2773_v4 }
 0x454   :  { %1098 = vst [vmem:[#allocation3 + $0x8] sm:$0xf0] %v1097_v7  ;;  %v1104_v9 = vrot.slane %v1097_v7, 4 }
 0x456   :  { %1171 = vmatmul.mubr.f32.vlgmr.msra.gmra.mrb[8].mxu0 %v1104_v9  ;;  %1242 = vmatmul.mubr.f32.vlgmr.msra.gmra.mrb[24].mxu1 %v1104_v9 }
 0x457   :  { %2486 = vmatpush1.bf16.msra.mxu0 %v3004_v15  ;;  %2518 = vmatpush1.bf16.msra.mxu1 %v3081_v63 }
 0x458   :  { %2488 = vmatprep.subr.bf16.mxu0 %v3022_v23  ;;  %2520 = vmatprep.subr.bf16.mxu1 %v3086_v2 }
 0x459   :  { %1348 = vmatprep.mubr.f32.mxu0 %v2915_v1  ;;  %1419 = vmatprep.mubr.f32.mxu1 %v2915_v1 }
 0x45b   :  { %2490 = vmatpush1.bf16.msra.mxu0 %v3026_v27  ;;  %2522 = vmatpush1.bf16.msra.mxu1 %v3094_v13 }
 0x45c   :  { %2492 = vmatprep.subr.bf16.mxu0 %v3031_v31  ;;  %2524 = vmatprep.subr.bf16.mxu1 %v3101_v17 }
 0x45f   :  { %2494 = vmatpush1.bf16.msra.mxu0 %v3042_v36  ;;  %2526 = vmatpush1.bf16.msra.mxu1 %v3109_v25 }
 0x460   :  { %2496 = vmatprep.subr.bf16.mxu0 %v3045_v37  ;;  %2528 = vmatprep.subr.bf16.mxu1 %v3116_v28 }
 0x463   :  { %2498 = vmatpush1.bf16.msra.mxu0 %v3058_v46  ;;  %2530 = vmatpush1.bf16.msra.mxu1 %v3122_v34 }
 0x464   :  { %2500 = vmatprep.subr.bf16.mxu0 %v3061_v47  ;;  %2532 = vmatprep.subr.bf16.mxu1 %v3127_v35 }
 0x467   :  { %2502 = vmatpush1.bf16.msra.mxu0 %v3073_v53  ;;  %2534 = vmatpush1.bf16.msra.mxu1 %v3134_v42 }
 0x468   :  { %2504 = vmatprep.subr.bf16.mxu0 %v3076_v57  ;;  %2536 = vmatprep.subr.bf16.mxu1 %v3137_v43 }
 0x46b   :  { %2506 = vmatpush1.bf16.msra.mxu0 %v3084_v0  ;;  %2538 = vmatpush1.bf16.msra.mxu1 %v3144_v51 }
 0x46c   :  { %2508 = vmatprep.subr.bf16.mxu0 %v3089_v6  ;;  %2540 = vmatprep.subr.bf16.mxu1 %v3147_v52 }
 0x46f   :  { %2510 = vmatpush1.bf16.msra.mxu0 %v3099_v16  ;;  %2542 = vmatpush1.bf16.msra.mxu1 %v3152_v59 }
 0x470   :  { %2512 = vmatprep.subr.bf16.mxu0 %v3104_v14  ;;  %2544 = vmatprep.subr.bf16.mxu1 %v3155_v60 }
 0x473   :  { %2514 = vmatpush1.bf16.msra.mxu0 %v3114_v26  ;;  %2546 = vmatpush1.bf16.msra.mxu1 %v3160_v3 }
 0x474   :  { %2548 = vmatprep.subr.bf16.mxu0 %v2995_v10  ;;  %2580 = vmatprep.subr.bf16.mxu1 %v3055_v45 }
 0x529   :  { %v1172_v5 = vpop.f32.mrb[8].mxu0  ;;  %v1243_v18 = vpop.f32.mrb[24].mxu1 }
 0x52a   :  { %v1248_v11 = vadd.f32 %v1172_v5, %v1099_v8  ;;  %v1174_v20 = vpop.f32.mrb[9].mxu0  ;;  %v1245_v12 = vpop.f32.mrb[25].mxu1  ;;  %v1250_v44 = vadd.f32 %v1243_v18, %v1101_v40 }
 0x52b   :  { %v1249_v21 = vadd.f32 %v1174_v20, %v1100_v19  ;;  %v1251_v38 = vadd.f32 %v1245_v12, %v1102_v30  ;;  %v1281_v30 = vld [vmem:[#allocation2 + $0x48] sm:$0xf0] }
 0x52c   :  { %v1252_v22 = vsub.f32 0.0, %v1248_v11 }
 0x52d   :  { %v1258_v24 = vsub.f32 0.0, %v1249_v21  ;;  %v1265_v32 = vsub.f32 0.0, %v1251_v38 }
 0x52e   :  { %v1253_v29 = vmul.f32 1.442695, %v1252_v22  ;;  %v1280_v22 = vld [vmem:[#allocation2 + $0x40] sm:$0xf0] }
 0x52f   :  { %v1259_v33 = vmul.f32 1.442695, %v1258_v24  ;;  %v1266_v41 = vmul.f32 1.442695, %v1265_v32 }
 0x530   :  { %2776 = vpow2.f32 %v1253_v29 }
 0x531   :  { %2778 = vpow2.f32 %v1259_v33 }
 0x532   :  { %2780 = vpow2.f32 %v1266_v41 }
 0x533   :  { %2782 = vtanh.f32 %v1250_v44  ;;  %v1283_v44 = vld [vmem:[#allocation2 + $0x58] sm:$0xf0] }
 0x53a   :  { %v2777_v48 = vpop.eup %2776 }
 0x53b   :  { %v2779_v49 = vpop.eup %2778  ;;  %v1255_v54 = vadd.f32 1.0, %v2777_v48 }
 0x53c   :  { %v1261_v56 = vadd.f32 1.0, %v2779_v49  ;;  %v2781_v39 = vpop.eup %2780 }
 0x53d   :  { %2784 = vrcp.f32 %v1255_v54  ;;  %v2783_v50 = vpop.eup %2782  ;;  %v1268_v7 = vadd.f32 1.0, %v2781_v39  ;;  %v1282_v54 = vld [vmem:[#allocation2 + $0x50] sm:$0xf0] }
 0x53e   :  { %2786 = vrcp.f32 %v1261_v56 }
 0x53f   :  { %2788 = vrcp.f32 %v1268_v7 }
 0x547   :  { %v2785_v61 = vpop.eup %2784 }
 0x548   :  { %v2787_v4 = vpop.eup %2786  ;;  %v1275_v55 = vmul.f32 %v2785_v61, %v2783_v50 }
 0x549   :  { %v1274_v9 = vmul.f32 %v2787_v4, %v1272_v58  ;;  %v2789_v5 = vpop.eup %2788 }
 0x54b   :  { %v3348_v8 = vadd.f32 %v1275_v55, %v1274_v9 }
 0x54d   :  { %2790 = vtanh.f32 %v3348_v8 }
 0x557   :  { %v2791_v18 = vpop.eup %2790 }
 0x558   :  { %v1278_v11 = vmul.f32 %v2791_v18, %v2789_v5  ;;  %v1462_v5 = vrot.slane %v3348_v8, 4 }
 0x55a   :  { %1279 = vst [vmem:[#allocation3 + $0x10] sm:$0xf] %v1278_v11  ;;  %1349 = vmatmul.mubr.f32.vlgmr.msra.gmra.mrb[10].mxu0 %v1278_v11  ;;  %1420 = vmatmul.mubr.f32.vlgmr.msra.gmra.mrb[26].mxu1 %v1278_v11 }
 0x55b   :  { %2550 = vmatpush1.bf16.msra.mxu0 %v3004_v15  ;;  %2582 = vmatpush1.bf16.msra.mxu1 %v3081_v63 }
 0x55c   :  { %2552 = vmatprep.subr.bf16.mxu0 %v3022_v23  ;;  %2584 = vmatprep.subr.bf16.mxu1 %v3086_v2 }
 0x55d   :  { %1541 = vmatprep.mubr.f32.mxu0 %v2915_v1  ;;  %1612 = vmatprep.mubr.f32.mxu1 %v2915_v1 }
 0x55f   :  { %2554 = vmatpush1.bf16.msra.mxu0 %v3026_v27  ;;  %2586 = vmatpush1.bf16.msra.mxu1 %v3094_v13 }
 0x560   :  { %2556 = vmatprep.subr.bf16.mxu0 %v3031_v31  ;;  %2588 = vmatprep.subr.bf16.mxu1 %v3101_v17 }
 0x563   :  { %2558 = vmatpush1.bf16.msra.mxu0 %v3042_v36  ;;  %2590 = vmatpush1.bf16.msra.mxu1 %v3109_v25 }
 0x564   :  { %2560 = vmatprep.subr.bf16.mxu0 %v3045_v37  ;;  %2592 = vmatprep.subr.bf16.mxu1 %v3116_v28 }
 0x567   :  { %2562 = vmatpush1.bf16.msra.mxu0 %v3058_v46  ;;  %2594 = vmatpush1.bf16.msra.mxu1 %v3122_v34 }
 0x568   :  { %2564 = vmatprep.subr.bf16.mxu0 %v3061_v47  ;;  %2596 = vmatprep.subr.bf16.mxu1 %v3127_v35 }
 0x56b   :  { %2566 = vmatpush1.bf16.msra.mxu0 %v3073_v53  ;;  %2598 = vmatpush1.bf16.msra.mxu1 %v3134_v42 }
 0x56c   :  { %2568 = vmatprep.subr.bf16.mxu0 %v3076_v57  ;;  %2600 = vmatprep.subr.bf16.mxu1 %v3137_v43 }
 0x56f   :  { %2570 = vmatpush1.bf16.msra.mxu0 %v3084_v0  ;;  %2602 = vmatpush1.bf16.msra.mxu1 %v3144_v51 }
 0x570   :  { %2572 = vmatprep.subr.bf16.mxu0 %v3089_v6  ;;  %2604 = vmatprep.subr.bf16.mxu1 %v3147_v52 }
 0x573   :  { %2574 = vmatpush1.bf16.msra.mxu0 %v3099_v16  ;;  %2606 = vmatpush1.bf16.msra.mxu1 %v3152_v59 }
 0x574   :  { %2576 = vmatprep.subr.bf16.mxu0 %v3104_v14  ;;  %2608 = vmatprep.subr.bf16.mxu1 %v3155_v60 }
 0x577   :  { %2578 = vmatpush1.bf16.msra.mxu0 %v3114_v26  ;;  %2610 = vmatpush1.bf16.msra.mxu1 %v3160_v3 }
 0x578   :  { %2612 = vmatprep.subr.bf16.mxu0 %v2995_v10  ;;  %2644 = vmatprep.subr.bf16.mxu1 %v3055_v45 }
 0x62d   :  { %v1350_v62 = vpop.f32.mrb[10].mxu0  ;;  %v1421_v19 = vpop.f32.mrb[26].mxu1 }
 0x62e   :  { %v1430_v20 = vrot.slane %v1350_v62, 4  ;;  %v1352_v12 = vpop.f32.mrb[11].mxu0  ;;  %v1423_v21 = vpop.f32.mrb[27].mxu1  ;;  %v1432_v45 = vrot.slane %v1421_v19, 4 }
 0x62f   :  { %v1431_v24 = vrot.slane %v1352_v12, 4  ;;  %v1433_v38 = vrot.slane %v1423_v21, 4 }
 0x630   :  { %v1438_v29 = vadd.f32 %v1430_v20, %v1280_v22  ;;  %v1440_v39 = vadd.f32 %v1432_v45, %v1282_v54  ;;  %v1875_v54 = vld [vmem:[%s3514_s4 + $0x10] sm:$0xff] }
 0x631   :  { %v1439_v33 = vadd.f32 %v1431_v24, %v1281_v30  ;;  %v1441_v49 = vadd.f32 %v1433_v38, %v1283_v44  ;;  %v1842_v44 = vld [vmem:[#allocation3 + $0x8] sm:$0xff] }
 0x632   :  { %v1442_v32 = vsub.f32 0.0, %v1438_v29 }
 0x633   :  { %v1448_v40 = vsub.f32 0.0, %v1439_v33  ;;  %v1455_v10 = vsub.f32 0.0, %v1441_v49  ;;  %v1846_v49 = vsub.f32 0.0, %v1842_v44 }
 0x634   :  { %v1443_v41 = vmul.f32 1.442695, %v1442_v32 }
 0x635   :  { %v1449_v48 = vmul.f32 1.442695, %v1448_v40  ;;  %v1456_v56 = vmul.f32 1.442695, %v1455_v10 }
 0x636   :  { %2792 = vpow2.f32 %v1443_v41 }
 0x637   :  { %2794 = vpow2.f32 %v1449_v48 }
 0x638   :  { %2796 = vpow2.f32 %v1456_v56  ;;  %v1876_v56 = vld [vmem:[%s3514_s4 + $0x18] sm:$0xff] }
 0x639   :  { %2798 = vtanh.f32 %v1440_v39 }
 0x640   :  { %v2793_v50 = vpop.eup %2792 }
 0x641   :  { %v2795_v61 = vpop.eup %2794  ;;  %v1445_v58 = vadd.f32 1.0, %v2793_v50  ;;  %v1851_v50 = vmul.f32 1.442695, %v1846_v49 }
 0x642   :  { %v1451_v4 = vadd.f32 1.0, %v2795_v61  ;;  %v2797_v55 = vpop.eup %2796 }
 0x643   :  { %2800 = vrcp.f32 %v1445_v58  ;;  %v2799_v7 = vpop.eup %2798  ;;  %v1458_v62 = vadd.f32 1.0, %v2797_v55  ;;  %v2679_v55 = vpack.c.bf16 %v1876_v56, %v1875_v54 }
 0x644   :  { %2802 = vrcp.f32 %v1451_v4 }
 0x645   :  { %2804 = vrcp.f32 %v1458_v62  ;;  %v1880_v62 = vld [vmem:[%s3514_s4 + $0x38] sm:$0xff] }
 0x64d   :  { %v2801_v9 = vpop.eup %2800 }
 0x64e   :  { %v2803_v18 = vpop.eup %2802  ;;  %v1465_v11 = vmul.f32 %v2801_v9, %v2799_v7  ;;  %v1877_v9 = vld [vmem:[%s3514_s4 + $0x20] sm:$0xff] }
 0x64f   :  { %v1464_v19 = vmul.f32 %v2803_v18, %v1462_v5  ;;  %v2805_v12 = vpop.eup %2804  ;;  %v1878_v5 = vld [vmem:[%s3514_s4 + $0x28] sm:$0xff] }
 0x650   :  { %v2683_v18 = vpack.c.bf16 %v1878_v5, %v1877_v9 }
 0x651   :  { %v3386_v20 = vadd.f32 %v1465_v11, %v1464_v19  ;;  %v1879_v11 = vld [vmem:[%s3514_s4 + $0x30] sm:$0xff] }
 0x652   :  { %v2687_v19 = vpack.c.bf16 %v1880_v62, %v1879_v11 }
 0x653   :  { %2806 = vtanh.f32 %v3386_v20  ;;  %v1643_v29 = vrot.slane %v3386_v20, 4  ;;  %v1881_v20 = vld [vmem:[%s3514_s4 + $0x40] sm:$0xff] }
 0x65d   :  { %v2807_v21 = vpop.eup %2806 }
 0x65e   :  { %v1468_v22 = vmul.f32 %v2807_v21, %v2805_v12  ;;  %v1882_v12 = vld [vmem:[%s3514_s4 + $0x48] sm:$0xff] }
 0x660   :  { %1469 = vst [vmem:[#allocation3 + $0x10] sm:$0xf0] %v1468_v22  ;;  %v1475_v24 = vrot.slane %v1468_v22, 4  ;;  %v2691_v22 = vpack.c.bf16 %v1882_v12, %v1881_v20 }
 0x662   :  { %1542 = vmatmul.mubr.f32.vlgmr.msra.gmra.mrb[12].mxu0 %v1475_v24  ;;  %1613 = vmatmul.mubr.f32.vlgmr.msra.gmra.mrb[28].mxu1 %v1475_v24 }
 0x663   :  { %2614 = vmatpush1.bf16.msra.mxu0 %v3004_v15  ;;  %2646 = vmatpush1.bf16.msra.mxu1 %v3081_v63  ;;  %v1874_v15 = vld [vmem:[%s3514_s4 + $0x8] sm:$0xff] }
 0x664   :  { %2616 = vmatprep.subr.bf16.mxu0 %v3022_v23  ;;  %2648 = vmatprep.subr.bf16.mxu1 %v3086_v2 }
 0x665   :  { %1719 = vmatprep.mubr.f32.mxu0 %v2915_v1  ;;  %1790 = vmatprep.mubr.f32.mxu1 %v2915_v1  ;;  %v1873_v1 = vld [vmem:[%s3514_s4] sm:$0xff] }
 0x666   :  { %v3427_v23 = vpack.c.bf16 %v1874_v15, %v1873_v1  ;;  %v1883_v1 = vld [vmem:[%s3514_s4 + $0x50] sm:$0xff]  ;;  %v1884_v15 = vld [vmem:[%s3514_s4 + $0x58] sm:$0xff] }
 0x667   :  { %2618 = vmatpush1.bf16.msra.mxu0 %v3026_v27  ;;  %2650 = vmatpush1.bf16.msra.mxu1 %v3094_v13  ;;  %v1470_v27 = vld [vmem:[#allocation2 + $0x60] sm:$0xf]  ;;  %v1843_v48 = vld [vmem:[#allocation3 + $0x10] sm:$0xff] }
 0x668   :  { %2620 = vmatprep.subr.bf16.mxu0 %v3031_v31  ;;  %2652 = vmatprep.subr.bf16.mxu1 %v3101_v17  ;;  %v1841_v17 = vld [vmem:[#allocation3] sm:$0xff]  ;;  %v1847_v10 = vsub.f32 0.0, %v1843_v48 }
 0x66a   :  { %v1853_v58 = vmul.f32 1.442695, %v1847_v10 }
 0x66b   :  { %2622 = vmatpush1.bf16.msra.mxu0 %v3042_v36  ;;  %2654 = vmatpush1.bf16.msra.mxu1 %v3109_v25 }
 0x66c   :  { %2624 = vmatprep.subr.bf16.mxu0 %v3045_v37  ;;  %2656 = vmatprep.subr.bf16.mxu1 %v3116_v28  ;;  %v1472_v28 = vld [vmem:[#allocation2 + $0x70] sm:$0xf] }
 0x66f   :  { %2626 = vmatpush1.bf16.msra.mxu0 %v3058_v46  ;;  %2658 = vmatpush1.bf16.msra.mxu1 %v3122_v34  ;;  %v1471_v46 = vld [vmem:[#allocation2 + $0x68] sm:$0xf] }
 0x670   :  { %2628 = vmatprep.subr.bf16.mxu0 %v3061_v47  ;;  %2660 = vmatprep.subr.bf16.mxu1 %v3127_v35 }
 0x673   :  { %2630 = vmatpush1.bf16.msra.mxu0 %v3073_v53  ;;  %2662 = vmatpush1.bf16.msra.mxu1 %v3134_v42 }
 0x674   :  { %2632 = vmatprep.subr.bf16.mxu0 %v3076_v57  ;;  %2664 = vmatprep.subr.bf16.mxu1 %v3137_v43 }
 0x677   :  { %2634 = vmatpush1.bf16.msra.mxu0 %v3084_v0  ;;  %2666 = vmatpush1.bf16.msra.mxu1 %v3144_v51 }
 0x678   :  { %2636 = vmatprep.subr.bf16.mxu0 %v3089_v6  ;;  %2668 = vmatprep.subr.bf16.mxu1 %v3147_v52  ;;  %v1473_v6 = vld [vmem:[#allocation2 + $0x78] sm:$0xf] }
 0x67b   :  { %2638 = vmatpush1.bf16.msra.mxu0 %v3099_v16  ;;  %2670 = vmatpush1.bf16.msra.mxu1 %v3152_v59 }
 0x67c   :  { %2640 = vmatprep.subr.bf16.mxu0 %v3104_v14  ;;  %2672 = vmatprep.subr.bf16.mxu1 %v3155_v60  ;;  %v1845_v14 = vsub.f32 0.0, %v1841_v17 }
 0x67f   :  { %2642 = vmatpush1.bf16.msra.mxu0 %v3114_v26  ;;  %2674 = vmatpush1.bf16.msra.mxu1 %v3160_v3  ;;  %v1849_v26 = vmul.f32 1.442695, %v1845_v14 }
 0x680   :  { %2676 = vmatprep.subr.bf16.mxu0 %v3427_v23 }
 0x735   :  { %v1543_v31 = vpop.f32.mrb[12].mxu0  ;;  %v1614_v36 = vpop.f32.mrb[28].mxu1 }
 0x736   :  { %v1619_v37 = vadd.f32 %v1543_v31, %v1470_v27  ;;  %v1545_v47 = vpop.f32.mrb[13].mxu0  ;;  %v1616_v53 = vpop.f32.mrb[29].mxu1  ;;  %v1621_v35 = vadd.f32 %v1614_v36, %v1472_v28  ;;  %v2695_v27 = vpack.c.bf16 %v1884_v15, %v1883_v1  ;;  %v1885_v36 = vld [vmem:[%s3514_s4 + $0x60] sm:$0xff] }
 0x737   :  { %v1620_v57 = vadd.f32 %v1545_v47, %v1471_v46  ;;  %v1622_v16 = vadd.f32 %v1616_v53, %v1473_v6  ;;  %v1887_v47 = vld [vmem:[%s3514_s4 + $0x70] sm:$0xff]  ;;  %v1888_v53 = vld [vmem:[%s3514_s4 + $0x78] sm:$0xff] }
 0x738   :  { %v1623_v63 = vsub.f32 0.0, %v1619_v37  ;;  %v1886_v37 = vld [vmem:[%s3514_s4 + $0x68] sm:$0xff] }
 0x739   :  { %v1629_v0 = vsub.f32 0.0, %v1620_v57  ;;  %v1636_v25 = vsub.f32 0.0, %v1622_v16  ;;  %v2699_v46 = vpack.c.bf16 %v1886_v37, %v1885_v36  ;;  %v2703_v57 = vpack.c.bf16 %v1888_v53, %v1887_v47 }
 0x73a   :  { %v1624_v2 = vmul.f32 1.442695, %v1623_v63 }
 0x73b   :  { %v1630_v13 = vmul.f32 1.442695, %v1629_v0  ;;  %v1637_v34 = vmul.f32 1.442695, %v1636_v25 }
 0x73c   :  { %2808 = vpow2.f32 %v1624_v2 }
 0x73d   :  { %2810 = vpow2.f32 %v1630_v13 }
 0x73e   :  { %2812 = vpow2.f32 %v1849_v26  ;;  %v1651_v26 = vld [vmem:[#allocation2 + $0x60] sm:$0xf0] }
 0x73f   :  { %2814 = vpow2.f32 %v1637_v34 }
 0x740   :  { %2816 = vtanh.f32 %v1621_v35  ;;  %v1652_v35 = vld [vmem:[#allocation2 + $0x68] sm:$0xf0] }
 0x746   :  { %v2809_v42 = vpop.eup %2808 }
 0x747   :  { %v2811_v43 = vpop.eup %2810  ;;  %v1626_v51 = vadd.f32 1.0, %v2809_v42 }
 0x748   :  { %v1632_v52 = vadd.f32 1.0, %v2811_v43  ;;  %v2813_v59 = vpop.eup %2812 }
 0x749   :  { %2818 = vrcp.f32 %v1626_v51  ;;  %v2815_v60 = vpop.eup %2814  ;;  %v1857_v30 = vadd.f32 1.0, %v2813_v59 }
 0x74a   :  { %2820 = vrcp.f32 %v1632_v52  ;;  %v2817_v3 = vpop.eup %2816  ;;  %v1639_v32 = vadd.f32 1.0, %v2815_v60  ;;  %v1654_v60 = vld [vmem:[#allocation2 + $0x78] sm:$0xf0] }
 0x74b   :  { %2822 = vrcp.f32 %v1857_v30 }
 0x74c   :  { %2824 = vrcp.f32 %v1639_v32 }
 0x753   :  { %v2819_v8 = vpop.eup %2818 }
 0x754   :  { %v2821_v33 = vpop.eup %2820  ;;  %v1646_v38 = vmul.f32 %v2819_v8, %v2817_v3 }
 0x755   :  { %v1645_v40 = vmul.f32 %v2821_v33, %v1643_v29  ;;  %v2823_v45 = vpop.eup %2822  ;;  %v1653_v33 = vld [vmem:[#allocation2 + $0x70] sm:$0xf0] }
 0x756   :  { %v2825_v39 = vpop.eup %2824  ;;  %v1869_v7 = vmul.f32 %v2823_v45, %v1841_v17  ;;  %v3480_v45 = vld [vmem:[%s3515_s5] ss:$0 sm:$0xff] }
 0x757   :  { %v3431_v41 = vadd.f32 %v1646_v38, %v1645_v40 }
 0x759   :  { %2826 = vtanh.f32 %v3431_v41 }
 0x75a   :  { %2828 = vpow2.f32 %v1851_v50 }
 0x75b   :  { %2830 = vpow2.f32 %v1853_v58 }
 0x763   :  { %v2827_v61 = vpop.eup %2826 }
 0x764   :  { %v1649_v4 = vmul.f32 %v2827_v61, %v2825_v39  ;;  %v2829_v21 = vpop.eup %2828  ;;  %v1833_v39 = vrot.slane %v3431_v41, 4 }
 0x765   :  { %v2831_v24 = vpop.eup %2830 }
 0x766   :  { %1650 = vst [vmem:[#allocation3 + $0x18] sm:$0xf] %v1649_v4  ;;  %1720 = vmatmul.mubr.f32.vlgmr.msra.gmra.mrb[14].mxu0 %v1649_v4  ;;  %1791 = vmatmul.mubr.f32.vlgmr.msra.gmra.mrb[30].mxu1 %v1649_v4  ;;  %v1859_v31 = vadd.f32 1.0, %v2831_v24 }
 0x767   :  { %2678 = vmatpush3.bf16.msra.mxu0 %v3427_v23  ;;  %2145 = vmatprep.mubr.f32.mxu0 %v1869_v7  ;;  %v1858_v23 = vadd.f32 1.0, %v2829_v21 }
 0x768   :  { %2680 = vmatprep.subr.bf16.mxu0 %v2679_v55 }
 0x769   :  { %2832 = vrcp.f32 %v1858_v23 }
 0x76a   :  { %2834 = vrcp.f32 %v1859_v31 }
 0x76b   :  { %2682 = vmatpush3.bf16.msra.mxu0 %v2679_v55 }
 0x76c   :  { %2684 = vmatprep.subr.bf16.mxu0 %v2683_v18 }
 0x76f   :  { %2686 = vmatpush3.bf16.msra.mxu0 %v2683_v18 }
 0x770   :  { %2688 = vmatprep.subr.bf16.mxu0 %v2687_v19 }
 0x773   :  { %2690 = vmatpush3.bf16.msra.mxu0 %v2687_v19  ;;  %v2833_v63 = vpop.eup %2832 }
 0x774   :  { %2692 = vmatprep.subr.bf16.mxu0 %v2691_v22  ;;  %v2835_v0 = vpop.eup %2834  ;;  %v1870_v2 = vmul.f32 %v2833_v63, %v1842_v44 }
 0x775   :  { %v1871_v6 = vmul.f32 %v2835_v0, %v1843_v48 }
 0x777   :  { %2694 = vmatpush3.bf16.msra.mxu0 %v2691_v22 }
 0x778   :  { %2696 = vmatprep.subr.bf16.mxu0 %v2695_v27 }
 0x77b   :  { %2698 = vmatpush3.bf16.msra.mxu0 %v2695_v27 }
 0x77c   :  { %2700 = vmatprep.subr.bf16.mxu0 %v2699_v46 }
 0x77f   :  { %2702 = vmatpush3.bf16.msra.mxu0 %v2699_v46  ;;  %v2091_v46 = vld [vmem:[%s3516_s6] ss:$0 sm:$0xff] }
 0x780   :  { %2704 = vmatprep.subr.bf16.mxu0 %v2703_v57 }
 0x783   :  { %2706 = vmatpush3.bf16.msra.mxu0 %v2703_v57 }
 0x786   :  { %2146 = vmatmul.mubr.f32.vlgmr.msra.gmra.mrb[16].mxu0 %v1870_v2 }
 0x787   :  { %2148 = vmatprep.mubr.f32.mxu0 %v1871_v6 }
 0x839   :  { %v1721_v13 = vpop.f32.mrb[14].mxu0  ;;  %v1792_v16 = vpop.f32.mrb[30].mxu1 }
 0x83a   :  { %v1801_v17 = vrot.slane %v1721_v13, 4  ;;  %v1723_v14 = vpop.f32.mrb[15].mxu0  ;;  %v1794_v25 = vpop.f32.mrb[31].mxu1  ;;  %v1803_v30 = vrot.slane %v1792_v16, 4 }
 0x83b   :  { %v1802_v28 = vrot.slane %v1723_v14, 4  ;;  %v1804_v43 = vrot.slane %v1794_v25, 4  ;;  %v2092_v14 = vld [vmem:[#allocation4] ss:$0 sm:$0xff] }
 0x83c   :  { %v1809_v34 = vadd.f32 %v1801_v17, %v1651_v26  ;;  %v1811_v32 = vadd.f32 %v1803_v30, %v1653_v33 }
 0x83d   :  { %v1810_v42 = vadd.f32 %v1802_v28, %v1652_v35  ;;  %v1812_v8 = vadd.f32 %v1804_v43, %v1654_v60 }
 0x83e   :  { %v1813_v51 = vsub.f32 0.0, %v1809_v34 }
 0x83f   :  { %v1819_v52 = vsub.f32 0.0, %v1810_v42  ;;  %v1826_v29 = vsub.f32 0.0, %v1812_v8 }
 0x840   :  { %v1814_v59 = vmul.f32 1.442695, %v1813_v51 }
 0x841   :  { %v1820_v3 = vmul.f32 1.442695, %v1819_v52  ;;  %v1827_v38 = vmul.f32 1.442695, %v1826_v29 }
 0x842   :  { %2836 = vpow2.f32 %v1814_v59 }
 0x843   :  { %2838 = vpow2.f32 %v1820_v3 }
 0x844   :  { %2840 = vpow2.f32 %v1827_v38 }
 0x845   :  { %2842 = vtanh.f32 %v1811_v32 }
 0x84c   :  { %v2837_v40 = vpop.eup %2836 }
 0x84d   :  { %v2839_v44 = vpop.eup %2838  ;;  %v1816_v48 = vadd.f32 1.0, %v2837_v40 }
 0x84e   :  { %v1822_v49 = vadd.f32 1.0, %v2839_v44  ;;  %v2841_v10 = vpop.eup %2840 }
 0x84f   :  { %2844 = vrcp.f32 %v1816_v48  ;;  %v2843_v54 = vpop.eup %2842  ;;  %v1829_v4 = vadd.f32 1.0, %v2841_v10 }
 0x850   :  { %2846 = vrcp.f32 %v1822_v49 }
 0x851   :  { %2848 = vrcp.f32 %v1829_v4 }
 0x859   :  { %v2845_v56 = vpop.eup %2844  ;;  %v2147_v50 = vpop.f32.mrb[16].mxu0 }
 0x85a   :  { %v2847_v61 = vpop.eup %2846  ;;  %v1836_v58 = vmul.f32 %v2845_v56, %v2843_v54  ;;  %v1968_v55 = vadd.f32 %v2147_v50, %v3480_v45  ;;  %v1962_v7 = vpop.f32.mrb[17].mxu0 }
 0x85b   :  { %v1835_v9 = vmul.f32 %v2847_v61, %v1833_v39  ;;  %v1963_v5 = vadd.f32 %v3480_v45, %v1962_v7  ;;  %v2849_v41 = vpop.eup %2848 }
 0x85c   :  { %v1982_v18 = vsub.f32 0.0, %v1968_v55 }
 0x85d   :  { %v1837_v11 = vadd.f32 %v1836_v58, %v1835_v9  ;;  %v1981_v62 = vsub.f32 0.0, %v1963_v5 }
 0x85e   :  { %v1987_v19 = vmul.f32 1.442695, %v1982_v18 }
 0x85f   :  { %2850 = vtanh.f32 %v1837_v11  ;;  %v1985_v20 = vmul.f32 1.442695, %v1981_v62 }
 0x860   :  { %2852 = vpow2.f32 %v1987_v19 }
 0x861   :  { %2854 = vpow2.f32 %v1985_v20 }
 0x869   :  { %v2851_v12 = vpop.eup %2850 }
 0x86a   :  { %v2853_v21 = vpop.eup %2852  ;;  %v1839_v22 = vmul.f32 %v2851_v12, %v2849_v41 }
 0x86b   :  { %v2855_v24 = vpop.eup %2854  ;;  %v1994_v1 = vadd.f32 1.0, %v2853_v21 }
 0x86c   :  { %1840 = vst [vmem:[#allocation3 + $0x18] sm:$0xf0] %v1839_v22  ;;  %v1993_v15 = vadd.f32 1.0, %v2855_v24 }
 0x86d   :  { %2856 = vrcp.f32 %v1994_v1 }
 0x86e   :  { %2858 = vrcp.f32 %v1993_v15 }
 0x873   :  { %v1844_v23 = vld [vmem:[#allocation3 + $0x18] sm:$0xff] }
 0x874   :  { %v1848_v27 = vsub.f32 0.0, %v1844_v23 }
 0x876   :  { %v1855_v31 = vmul.f32 1.442695, %v1848_v27 }
 0x877   :  { %v2857_v36 = vpop.eup %2856 }
 0x878   :  { %v2859_v37 = vpop.eup %2858  ;;  %2860 = vpow2.f32 %v1855_v31  ;;  %v2006_v47 = vmul.f32 %v2857_v36, %v1968_v55 }
 0x879   :  { %v2005_v53 = vmul.f32 %v2859_v37, %v1963_v5 }
 0x87a   :  { %v2017_v0 = vmul.f32 %v2091_v46, %v2006_v47 }
 0x87b   :  { %v2016_v57 = vmul.f32 %v2091_v46, %v2005_v53 }
 0x87c   :  { %v2024_v2 = vsel %vm2020_vm4, %v2017_v0, 0.0 }
 0x87d   :  { %v2021_v63 = vsel %vm2020_vm4, %v2016_v57, 0.0 }
 0x87e   :  { %2022 = vadd.xlane.f32.xlu0 %v2021_v63 }
 0x882   :  { %v2861_v6 = vpop.eup %2860  ;;  %2025 = vadd.xlane.f32.xlu0 %v2024_v2 }
 0x883   :  { %v1860_v13 = vadd.f32 1.0, %v2861_v6 }
 0x885   :  { %2862 = vrcp.f32 %v1860_v13 }
 0x88f   :  { %v2863_v16 = vpop.eup %2862 }
 0x890   :  { %v1872_v17 = vmul.f32 %v2863_v16, %v1844_v23 }
 0x892   :  { %2149 = vmatmul.mubr.f32.gmra.mrb[18].mxu0 %v1872_v17 }
 0x90b   :  { %v2023_v25 = vpop.xlane.xlu0 %2022 }
 0x90c   :  { %v2040_v26 = vadd.f32 %v2092_v14, %v2023_v25 }
 0x90e   :  { %v2044_v28 = vsub.f32 0.0, %v2040_v26 }
 0x90f   :  { %v2026_v34 = vpop.xlane.xlu0 %2025 }
 0x910   :  { %v2048_v35 = vmul.f32 1.442695, %v2044_v28  ;;  %v2041_v42 = vadd.f32 %v2092_v14, %v2026_v34 }
 0x912   :  { %2864 = vpow2.f32 %v2048_v35  ;;  %v2045_v43 = vsub.f32 0.0, %v2041_v42 }
 0x914   :  { %v2050_v51 = vmul.f32 1.442695, %v2045_v43 }
 0x916   :  { %2866 = vpow2.f32 %v2050_v51 }
 0x91c   :  { %v2865_v52 = vpop.eup %2864 }
 0x91d   :  { %v2056_v59 = vadd.f32 1.0, %v2865_v52 }
 0x91f   :  { %2868 = vrcp.f32 %v2056_v59 }
 0x920   :  { %v2867_v60 = vpop.eup %2866 }
 0x921   :  { %v2057_v3 = vadd.f32 1.0, %v2867_v60 }
 0x923   :  { %2870 = vrcp.f32 %v2057_v3 }
 0x929   :  { %v2869_v8 = vpop.eup %2868 }
 0x92a   :  { %2069 = vst.msk [vmem:[%s3518_s8] sm:$0xff] %vm2068_vm5, %v2869_v8 }
 0x92d   :  { %v2871_v29 = vpop.eup %2870 }
 0x92e   :  { %2070 = vst.msk [vmem:[%s3518_s8 + $0x8] sm:$0xff] %vm2068_vm5, %v2871_v29 }
 0x965   :  { %v2150_v30 = vpop.f32.mrb[18].mxu0 }
 0x966   :  { %v1978_v33 = vadd.f32 %v2150_v30, %v3480_v45  ;;  %v1972_v38 = vpop.f32.mrb[19].mxu0 }
 0x967   :  { %v1973_v32 = vadd.f32 %v3480_v45, %v1972_v38 }
 0x968   :  { %v1984_v40 = vsub.f32 0.0, %v1978_v33 }
 0x969   :  { %v1983_v44 = vsub.f32 0.0, %v1973_v32 }
 0x96a   :  { %v1991_v48 = vmul.f32 1.442695, %v1984_v40 }
 0x96b   :  { %v1989_v49 = vmul.f32 1.442695, %v1983_v44 }
 0x96c   :  { %2872 = vpow2.f32 %v1991_v48 }
 0x96d   :  { %2874 = vpow2.f32 %v1989_v49 }
 0x976   :  { %v2873_v10 = vpop.eup %2872 }
 0x977   :  { %v2875_v54 = vpop.eup %2874  ;;  %v1996_v56 = vadd.f32 1.0, %v2873_v10 }
 0x978   :  { %v1995_v39 = vadd.f32 1.0, %v2875_v54 }
 0x979   :  { %2876 = vrcp.f32 %v1996_v56 }
 0x97a   :  { %2878 = vrcp.f32 %v1995_v39 }
 0x983   :  { %v2877_v50 = vpop.eup %2876 }
 0x984   :  { %v2879_v61 = vpop.eup %2878  ;;  %v2008_v58 = vmul.f32 %v2877_v50, %v1978_v33 }
 0x985   :  { %v2007_v4 = vmul.f32 %v2879_v61, %v1973_v32 }
 0x986   :  { %v2019_v45 = vmul.f32 %v2091_v46, %v2008_v58 }
 0x987   :  { %v2018_v55 = vmul.f32 %v2091_v46, %v2007_v4 }
 0x988   :  { %v2030_v9 = vsel %vm2020_vm4, %v2019_v45, 0.0 }
 0x989   :  { %v2027_v7 = vsel %vm2020_vm4, %v2018_v55, 0.0 }
 0x98a   :  { %2028 = vadd.xlane.f32.xlu1 %v2027_v7 }
 0x98e   :  { %2031 = vadd.xlane.f32.xlu1 %v2030_v9 }
 0xa17   :  { %v2029_v5 = vpop.xlane.xlu1 %2028 }
 0xa18   :  { %v2042_v18 = vadd.f32 %v2092_v14, %v2029_v5 }
 0xa1a   :  { %v2046_v11 = vsub.f32 0.0, %v2042_v18 }
 0xa1b   :  { %v2032_v62 = vpop.xlane.xlu1 %2031 }
 0xa1c   :  { %v2052_v19 = vmul.f32 1.442695, %v2046_v11  ;;  %v2043_v20 = vadd.f32 %v2092_v14, %v2032_v62 }
 0xa1e   :  { %2880 = vpow2.f32 %v2052_v19  ;;  %v2047_v41 = vsub.f32 0.0, %v2043_v20 }
 0xa20   :  { %v2054_v12 = vmul.f32 1.442695, %v2047_v41 }
 0xa22   :  { %2882 = vpow2.f32 %v2054_v12 }
 0xa28   :  { %v2881_v21 = vpop.eup %2880 }
 0xa29   :  { %v2058_v22 = vadd.f32 1.0, %v2881_v21 }
 0xa2b   :  { %2884 = vrcp.f32 %v2058_v22 }
 0xa2c   :  { %v2883_v24 = vpop.eup %2882 }
 0xa2d   :  { %v2059_v1 = vadd.f32 1.0, %v2883_v24 }
 0xa2f   :  { %2886 = vrcp.f32 %v2059_v1 }
 0xa35   :  { %v2885_v15 = vpop.eup %2884 }
 0xa36   :  { %2071 = vst.msk [vmem:[%s3518_s8 + $0x10] sm:$0xff] %vm2068_vm5, %v2885_v15 }
 0xa39   :  { %v2887_v23 = vpop.eup %2886 }
 0xa3a   :  { %2072 = vst.msk [vmem:[%s3518_s8 + $0x18] sm:$0xff] %vm2068_vm5, %v2887_v23 }
 0xa3b   :  { %2077 = vsyncpa [#allocation6], 1 }

</bundles_post_ra>
